<compile_context>
chip_gen: v7x
topology: tpu7x:2x2x1
jax: 0.10.0
libtpu: 0.0.40
codegen_flags: <defaults>
</compile_context>

<pallas_src>
import functools

import jax
import jax.numpy as jnp
import numpy as np
from jax.experimental import pallas as pl
from jax.experimental.pallas import tpu as pltpu

D_IN = 784            # flattened 28x28 image (kept at natural width in HBM)
D_H = 400             # hidden width (logical)
D_H_P = 512           # hidden width padded to 4 * 128 lanes (MXU-aligned)
D_Z = 20              # latent width (logical)
D_Z_P = 128           # each latent head padded to one full lane group

_COMPUTE_DTYPE = jnp.bfloat16   # MXU input dtype (accumulation stays float32)


def _vae_kernel(x_ref, eps_ref,
                w1_ref, b1_ref,
                w2_ref, b2_ref,
                w3_ref, b3_ref,
                w4_ref, b4_ref,
                recon_ref, mu_ref, logvar_ref):
    cdt = w1_ref.dtype  # compute (MXU input) dtype

    # ---- encode: h1 = relu(x @ W1 + b1) ----
    x = x_ref[...].astype(cdt)
    h1 = jnp.dot(x, w1_ref[...], preferred_element_type=jnp.float32) + b1_ref[...]
    h1 = jnp.maximum(h1, 0.0)

    # ---- fused heads: [mu | logvar] = h1 @ [W21_pad | W22_pad] + [b21 | b22] ----
    y = jnp.dot(h1.astype(cdt), w2_ref[...],
                preferred_element_type=jnp.float32) + b2_ref[...]
    mu = y[:, :D_Z_P]        # lane-aligned split (each head is one 128-lane group)
    logvar = y[:, D_Z_P:]

    # ---- reparameterize (training semantics): z = mu + eps * exp(0.5*logvar) ----
    # Pad lanes: mu/logvar pads are 0, eps pad is 0 and w3 pad rows are 0, so
    # padded z contributes exactly nothing downstream.
    z = mu + eps_ref[...] * jnp.exp(0.5 * logvar)

    # ---- decode: recon = relu(relu(z @ W3 + b3) @ W4 + b4) ----
    h3 = jnp.dot(z.astype(cdt), w3_ref[...],
                 preferred_element_type=jnp.float32) + b3_ref[...]
    h3 = jnp.maximum(h3, 0.0)
    recon = jnp.dot(h3.astype(cdt), w4_ref[...],
                    preferred_element_type=jnp.float32) + b4_ref[...]
    recon = jnp.maximum(recon, 0.0)   # spec applies ReLU (not sigmoid) to fc4 output

    recon_ref[...] = recon.astype(recon_ref.dtype)
    mu_ref[...] = mu.astype(mu_ref.dtype)
    logvar_ref[...] = logvar.astype(logvar_ref.dtype)


def _prepare_params(params, compute_dtype=_COMPUTE_DTYPE):
    """Pad / fuse / downcast the raw f32 params for the kernel.

    Raw layout: weights (in_features, out_features), biases (1, out_features).
    Zero padding guarantees the padded lanes/rows contribute exactly 0.
    """
    (w1, b1, w21, b21, w22, b22, w3, b3, w4, b4) = params

    def pad2(a, rows, cols):
        return jnp.pad(a, ((0, rows - a.shape[0]), (0, cols - a.shape[1])))

    w1p = pad2(w1, D_IN, D_H_P).astype(compute_dtype)                 # (784, 512)
    b1p = pad2(b1.reshape(1, D_H), 1, D_H_P).astype(jnp.float32)      # (1, 512)

    w2p = jnp.concatenate(
        [pad2(w21, D_H_P, D_Z_P), pad2(w22, D_H_P, D_Z_P)], axis=1
    ).astype(compute_dtype)                                           # (512, 256)
    b2p = jnp.concatenate(
        [pad2(b21.reshape(1, D_Z), 1, D_Z_P),
         pad2(b22.reshape(1, D_Z), 1, D_Z_P)], axis=1
    ).astype(jnp.float32)                                             # (1, 256)

    w3p = pad2(w3, D_Z_P, D_H_P).astype(compute_dtype)                # (128, 512)
    b3p = pad2(b3.reshape(1, D_H), 1, D_H_P).astype(jnp.float32)      # (1, 512)

    w4p = pad2(w4, D_H_P, D_IN).astype(compute_dtype)                 # (512, 784)
    b4p = b4.reshape(1, D_IN).astype(jnp.float32)                     # (1, 784)

    return (w1p, b1p, w2p, b2p, w3p, b3p, w4p, b4p)


@functools.partial(jax.jit, static_argnames=("tile_b",))
def vae_forward(x_img, eps, params, tile_b=512):
    """VAE forward.

    x_img : (B, 1, 28, 28) float32 (or bfloat16 — cast happens in-kernel)
    eps   : (B, 20) float32 standard-normal noise (training-mode reparameterize)
    params: raw f32 params from init_params()
    Returns (recon (B, 784), mu (B, 20), logvar (B, 20)), all float32.

    tile_b: max batch-tile rows (multiple of 8). 512 is a good default on all
    generations; v6e can go to 1024-2048 (raise vmem_limit_bytes accordingly),
    v7x should stay <= 1024 (64 MiB VMEM per TensorCore).
    """
    assert tile_b % 8 == 0, "tile_b must be a multiple of 8"
    B = x_img.shape[0]
    x = x_img.reshape(B, D_IN)   # free reshape; dtype preserved (no wrapper cast / pad of features)

    # ---- batch tiling: minimal padding, >=2 grid steps whenever possible ----
    b8 = 8 * pl.cdiv(B, 8)                                   # sublane quantum
    n_tiles = max(pl.cdiv(b8, tile_b), 2 if b8 >= 128 else 1)
    tb = 8 * pl.cdiv(b8, 8 * n_tiles)                        # per-tile rows (<= tile_b, multiple of 8)
    b_pad = tb * n_tiles

    if b_pad != B:
        x = jnp.pad(x, ((0, b_pad - B), (0, 0)))             # batch-only pad (no feature pad)
    eps_p = jnp.pad(eps, ((0, b_pad - B), (0, D_Z_P - D_Z)))  # tiny: 20 -> 128 lanes

    weight_args = _prepare_params(params)

    def act_spec(cols):     # streamed per batch tile (double-buffered by Pallas)
        return pl.BlockSpec((tb, cols), lambda i: (i, 0))

    def res_spec(shape):    # grid-invariant -> stays VMEM-resident across tiles
        return pl.BlockSpec(shape, lambda i: (0, 0))

    # Advisory cost estimate so XLA schedules the custom call sensibly.
    flops = 2 * b_pad * (D_IN * D_H_P + D_H_P * 2 * D_Z_P + D_Z_P * D_H_P + D_H_P * D_IN)
    bytes_accessed = int(
        sum(int(np.prod(w.shape)) * w.dtype.itemsize for w in weight_args)
        + b_pad * D_IN * x.dtype.itemsize
        + int(np.prod(eps_p.shape)) * eps_p.dtype.itemsize
        + b_pad * (D_IN + 2 * D_Z_P) * 4
    )
    cost = pl.CostEstimate(flops=int(flops),
                           transcendentals=int(b_pad * D_Z_P),
                           bytes_accessed=bytes_accessed)

    recon_p, mu_p, logvar_p = pl.pallas_call(
        _vae_kernel,
        grid=(n_tiles,),
        in_specs=[
            act_spec(D_IN),                 # x tile (natural 784-wide layout)
            act_spec(D_Z_P),                # eps tile
            res_spec((D_IN, D_H_P)),        # w1  (784, 512)
            res_spec((1, D_H_P)),           # b1
            res_spec((D_H_P, 2 * D_Z_P)),   # w2  (fused fc21 | fc22, each head padded to 128)
            res_spec((1, 2 * D_Z_P)),       # b2
            res_spec((D_Z_P, D_H_P)),       # w3  (rows padded 20 -> 128 with zeros)
            res_spec((1, D_H_P)),           # b3
            res_spec((D_H_P, D_IN)),        # w4  (512, 784)
            res_spec((1, D_IN)),            # b4
        ],
        out_specs=(
            act_spec(D_IN),                 # recon tile (784-wide; last 16 lanes masked store)
            act_spec(D_Z_P),                # mu tile
            act_spec(D_Z_P),                # logvar tile
        ),
        out_shape=(
            jax.ShapeDtypeStruct((b_pad, D_IN), jnp.float32),
            jax.ShapeDtypeStruct((b_pad, D_Z_P), jnp.float32),
            jax.ShapeDtypeStruct((b_pad, D_Z_P), jnp.float32),
        ),
        compiler_params=pltpu.CompilerParams(
            dimension_semantics=("parallel",),   # v7x: shard batch tiles over both TCs
            # ~48 MiB covers tb <= 1024 on every generation (v7x physical VMEM
            # is 64 MiB/TC); raise toward 96 MiB on v5e/v6e if tile_b = 2048.
            vmem_limit_bytes=48 * 1024 * 1024,
        ),
        cost_estimate=cost,
    )(x, eps_p, *weight_args)

    return recon_p[:B], mu_p[:B, :D_Z], logvar_p[:B, :D_Z]


def vae_reference(x_img, eps, params):
    """Pure-JAX f32 reference matching the PyTorch module's forward (training mode)."""
    (w1, b1, w21, b21, w22, b22, w3, b3, w4, b4) = params
    x = x_img.reshape(x_img.shape[0], D_IN)
    h1 = jnp.maximum(x @ w1 + b1, 0.0)
    mu = h1 @ w21 + b21
    logvar = h1 @ w22 + b22
    z = mu + eps * jnp.exp(0.5 * logvar)
    h3 = jnp.maximum(z @ w3 + b3, 0.0)
    recon = jnp.maximum(h3 @ w4 + b4, 0.0)
    return recon, mu, logvar


def init_params(key):
    """Deterministic init mimicking nn.Linear's U(-1/sqrt(fan_in), 1/sqrt(fan_in)).
    Weights stored as (in_features, out_features); biases as (1, out_features)."""
    def linear(k, fan_in, fan_out):
        kw, kb = jax.random.split(k)
        bound = 1.0 / jnp.sqrt(float(fan_in))
        w = jax.random.uniform(kw, (fan_in, fan_out), jnp.float32, -bound, bound)
        b = jax.random.uniform(kb, (1, fan_out), jnp.float32, -bound, bound)
        return w, b

    k1, k21, k22, k3, k4 = jax.random.split(key, 5)
    w1, b1 = linear(k1, D_IN, D_H)      # fc1
    w21, b21 = linear(k21, D_H, D_Z)    # fc21
    w22, b22 = linear(k22, D_H, D_Z)    # fc22
    w3, b3 = linear(k3, D_Z, D_H)       # fc3
    w4, b4 = linear(k4, D_H, D_IN)      # fc4
    return (w1, b1, w21, b21, w22, b22, w3, b3, w4, b4)


if __name__ == "__main__":
    key = jax.random.PRNGKey(0)
    k_params, k_x, k_eps = jax.random.split(key, 3)

    params = init_params(k_params)

    B = 2
    x_img = jax.random.uniform(k_x, (B, 1, 28, 28), jnp.float32)   # MNIST-like NCHW input
    eps = jax.random.normal(k_eps, (B, D_Z), jnp.float32)          # reparameterization noise

    recon, mu, logvar = vae_forward(x_img, eps, params)
    jax.block_until_ready((recon, mu, logvar))

    assert recon.shape == (B, D_IN)
    assert mu.shape == (B, D_Z)
    assert logvar.shape == (B, D_Z)

    # Loose-tolerance sanity check vs a pure-JAX f32 reference
    # (kernel matmul inputs run in bf16 with f32 accumulation).
    r_ref, m_ref, lv_ref = vae_reference(x_img, eps, params)
    np.testing.assert_allclose(np.asarray(mu), np.asarray(m_ref), rtol=3e-2, atol=3e-2)
    np.testing.assert_allclose(np.asarray(logvar), np.asarray(lv_ref), rtol=3e-2, atol=3e-2)
    np.testing.assert_allclose(np.asarray(recon), np.asarray(r_ref), rtol=3e-2, atol=3e-2)

    print("KERNEL_OK")
</pallas_src>

<mosaic_0001>
module attributes {stable_mosaic.version = 11 : i64} {
  func.func @_vae_kernel(%arg0: i32, %arg1: memref<8x784xf32, #tpu.memory_space<vmem>>, %arg2: memref<8x128xf32, #tpu.memory_space<vmem>>, %arg3: memref<784x512xbf16, #tpu.memory_space<vmem>>, %arg4: memref<1x512xf32, #tpu.memory_space<vmem>>, %arg5: memref<512x256xbf16, #tpu.memory_space<vmem>>, %arg6: memref<1x256xf32, #tpu.memory_space<vmem>>, %arg7: memref<128x512xbf16, #tpu.memory_space<vmem>>, %arg8: memref<1x512xf32, #tpu.memory_space<vmem>>, %arg9: memref<512x784xbf16, #tpu.memory_space<vmem>>, %arg10: memref<1x784xf32, #tpu.memory_space<vmem>>, %arg11: memref<8x784xf32, #tpu.memory_space<vmem>>, %arg12: memref<8x128xf32, #tpu.memory_space<vmem>>, %arg13: memref<8x128xf32, #tpu.memory_space<vmem>>) attributes {dimension_semantics = [#tpu.dimension_semantics<parallel>], iteration_bounds = array<i64: 1>, scalar_prefetch = 0 : i64, scratch_operands = 0 : i64, tpu.core_type = #tpu.core_type<tc>, window_params = [{transform_indices = @transform_0, window_bounds = array<i64: 8, 784>}, {transform_indices = @transform_1, window_bounds = array<i64: 8, 128>}, {pipeline_mode = #tpu.pipeline_mode<synchronous>, transform_indices = @transform_2, window_bounds = array<i64: 784, 512>}, {pipeline_mode = #tpu.pipeline_mode<synchronous>, transform_indices = @transform_3, window_bounds = array<i64: 1, 512>}, {pipeline_mode = #tpu.pipeline_mode<synchronous>, transform_indices = @transform_4, window_bounds = array<i64: 512, 256>}, {pipeline_mode = #tpu.pipeline_mode<synchronous>, transform_indices = @transform_5, window_bounds = array<i64: 1, 256>}, {pipeline_mode = #tpu.pipeline_mode<synchronous>, transform_indices = @transform_6, window_bounds = array<i64: 128, 512>}, {pipeline_mode = #tpu.pipeline_mode<synchronous>, transform_indices = @transform_7, window_bounds = array<i64: 1, 512>}, {pipeline_mode = #tpu.pipeline_mode<synchronous>, transform_indices = @transform_8, window_bounds = array<i64: 512, 784>}, {pipeline_mode = #tpu.pipeline_mode<synchronous>, transform_indices = @transform_9, window_bounds = array<i64: 1, 784>}, {transform_indices = @transform_10, window_bounds = array<i64: 8, 784>}, {transform_indices = @transform_11, window_bounds = array<i64: 8, 128>}, {transform_indices = @transform_12, window_bounds = array<i64: 8, 128>}]} {
    %c0 = arith.constant 0 : index
    %c0_0 = arith.constant 0 : index
    %0 = vector.load %arg1[%c0, %c0_0] : memref<8x784xf32, #tpu.memory_space<vmem>>, vector<8x784xf32>
    %1 = arith.truncf %0 : vector<8x784xf32> to vector<8x784xbf16>
    %c0_1 = arith.constant 0 : index
    %c0_2 = arith.constant 0 : index
    %2 = vector.load %arg3[%c0_1, %c0_2] : memref<784x512xbf16, #tpu.memory_space<vmem>>, vector<784x512xbf16>
    %cst = arith.constant dense<0.000000e+00> : vector<8x512xf32>
    %3 = tpu.matmul %1, %2, %cst {dimension_numbers = #tpu.dot_dimension_numbers<[1], [0], [0], [1], [0, 0, 1, 1], [], []>} : vector<8x784xbf16>, vector<784x512xbf16>, vector<8x512xf32> -> vector<8x512xf32>
    %c0_3 = arith.constant 0 : index
    %c0_4 = arith.constant 0 : index
    %4 = vector.load %arg4[%c0_3, %c0_4] : memref<1x512xf32, #tpu.memory_space<vmem>>, vector<1x512xf32>
    %5 = vector.broadcast %4 : vector<1x512xf32> to vector<8x512xf32>
    %6 = arith.addf %3, %5 : vector<8x512xf32>
    %cst_5 = arith.constant 0.000000e+00 : f32
    %7 = vector.broadcast %cst_5 : f32 to vector<8x512xf32>
    %8 = arith.maximumf %6, %7 : vector<8x512xf32>
    %9 = arith.truncf %8 : vector<8x512xf32> to vector<8x512xbf16>
    %c0_6 = arith.constant 0 : index
    %c0_7 = arith.constant 0 : index
    %10 = vector.load %arg5[%c0_6, %c0_7] : memref<512x256xbf16, #tpu.memory_space<vmem>>, vector<512x256xbf16>
    %cst_8 = arith.constant dense<0.000000e+00> : vector<8x256xf32>
    %11 = tpu.matmul %9, %10, %cst_8 {dimension_numbers = #tpu.dot_dimension_numbers<[1], [0], [0], [1], [0, 0, 1, 1], [], []>} : vector<8x512xbf16>, vector<512x256xbf16>, vector<8x256xf32> -> vector<8x256xf32>
    %c0_9 = arith.constant 0 : index
    %c0_10 = arith.constant 0 : index
    %12 = vector.load %arg6[%c0_9, %c0_10] : memref<1x256xf32, #tpu.memory_space<vmem>>, vector<1x256xf32>
    %13 = vector.broadcast %12 : vector<1x256xf32> to vector<8x256xf32>
    %14 = arith.addf %11, %13 : vector<8x256xf32>
    %15 = vector.extract_strided_slice %14 {offsets = [0, 0], sizes = [8, 128], strides = [1, 1]} : vector<8x256xf32> to vector<8x128xf32>
    %16 = vector.extract_strided_slice %14 {offsets = [0, 128], sizes = [8, 128], strides = [1, 1]} : vector<8x256xf32> to vector<8x128xf32>
    %c0_11 = arith.constant 0 : index
    %c0_12 = arith.constant 0 : index
    %17 = vector.load %arg2[%c0_11, %c0_12] : memref<8x128xf32, #tpu.memory_space<vmem>>, vector<8x128xf32>
    %cst_13 = arith.constant 5.000000e-01 : f32
    %18 = vector.broadcast %cst_13 : f32 to vector<8x128xf32>
    %19 = arith.mulf %18, %16 : vector<8x128xf32>
    %20 = math.exp %19 : vector<8x128xf32>
    %21 = arith.mulf %17, %20 : vector<8x128xf32>
    %22 = arith.addf %15, %21 : vector<8x128xf32>
    %23 = arith.truncf %22 : vector<8x128xf32> to vector<8x128xbf16>
    %c0_14 = arith.constant 0 : index
    %c0_15 = arith.constant 0 : index
    %24 = vector.load %arg7[%c0_14, %c0_15] : memref<128x512xbf16, #tpu.memory_space<vmem>>, vector<128x512xbf16>
    %cst_16 = arith.constant dense<0.000000e+00> : vector<8x512xf32>
    %25 = tpu.matmul %23, %24, %cst_16 {dimension_numbers = #tpu.dot_dimension_numbers<[1], [0], [0], [1], [0, 0, 1, 1], [], []>} : vector<8x128xbf16>, vector<128x512xbf16>, vector<8x512xf32> -> vector<8x512xf32>
    %c0_17 = arith.constant 0 : index
    %c0_18 = arith.constant 0 : index
    %26 = vector.load %arg8[%c0_17, %c0_18] : memref<1x512xf32, #tpu.memory_space<vmem>>, vector<1x512xf32>
    %27 = vector.broadcast %26 : vector<1x512xf32> to vector<8x512xf32>
    %28 = arith.addf %25, %27 : vector<8x512xf32>
    %cst_19 = arith.constant 0.000000e+00 : f32
    %29 = vector.broadcast %cst_19 : f32 to vector<8x512xf32>
    %30 = arith.maximumf %28, %29 : vector<8x512xf32>
    %31 = arith.truncf %30 : vector<8x512xf32> to vector<8x512xbf16>
    %c0_20 = arith.constant 0 : index
    %c0_21 = arith.constant 0 : index
    %32 = vector.load %arg9[%c0_20, %c0_21] : memref<512x784xbf16, #tpu.memory_space<vmem>>, vector<512x784xbf16>
    %cst_22 = arith.constant dense<0.000000e+00> : vector<8x784xf32>
    %33 = tpu.matmul %31, %32, %cst_22 {dimension_numbers = #tpu.dot_dimension_numbers<[1], [0], [0], [1], [0, 0, 1, 1], [], []>} : vector<8x512xbf16>, vector<512x784xbf16>, vector<8x784xf32> -> vector<8x784xf32>
    %c0_23 = arith.constant 0 : index
    %c0_24 = arith.constant 0 : index
    %34 = vector.load %arg10[%c0_23, %c0_24] : memref<1x784xf32, #tpu.memory_space<vmem>>, vector<1x784xf32>
    %35 = vector.broadcast %34 : vector<1x784xf32> to vector<8x784xf32>
    %36 = arith.addf %33, %35 : vector<8x784xf32>
    %cst_25 = arith.constant 0.000000e+00 : f32
    %37 = vector.broadcast %cst_25 : f32 to vector<8x784xf32>
    %38 = arith.maximumf %36, %37 : vector<8x784xf32>
    %c0_26 = arith.constant 0 : index
    %c0_27 = arith.constant 0 : index
    %39 = vector.load %arg11[%c0_26, %c0_27] : memref<8x784xf32, #tpu.memory_space<vmem>>, vector<8x784xf32>
    tpu.vector_store %arg11[%c0_26, %c0_27], %38 {strides = array<i32>} : memref<8x784xf32, #tpu.memory_space<vmem>>, vector<8x784xf32>,
    %c0_28 = arith.constant 0 : index
    %c0_29 = arith.constant 0 : index
    %40 = vector.load %arg12[%c0_28, %c0_29] : memref<8x128xf32, #tpu.memory_space<vmem>>, vector<8x128xf32>
    tpu.vector_store %arg12[%c0_28, %c0_29], %15 {strides = array<i32>} : memref<8x128xf32, #tpu.memory_space<vmem>>, vector<8x128xf32>,
    %c0_30 = arith.constant 0 : index
    %c0_31 = arith.constant 0 : index
    %41 = vector.load %arg13[%c0_30, %c0_31] : memref<8x128xf32, #tpu.memory_space<vmem>>, vector<8x128xf32>
    tpu.vector_store %arg13[%c0_30, %c0_31], %16 {strides = array<i32>} : memref<8x128xf32, #tpu.memory_space<vmem>>, vector<8x128xf32>,
    return
  }
  func.func @transform_0(%arg0: i32) -> (i32, i32) {
    %c0_i32 = arith.constant 0 : i32
    %c0_i32_0 = arith.constant 0 : i32
    return %arg0, %c0_i32 : i32, i32
  }
  func.func @transform_1(%arg0: i32) -> (i32, i32) {
    %c0_i32 = arith.constant 0 : i32
    %c0_i32_0 = arith.constant 0 : i32
    return %arg0, %c0_i32 : i32, i32
  }
  func.func @transform_2(%arg0: i32) -> (i32, i32) {
    %c0_i32 = arith.constant 0 : i32
    %c0_i32_0 = arith.constant 0 : i32
    %c0_i32_1 = arith.constant 0 : i32
    return %c0_i32, %c0_i32_0 : i32, i32
  }
  func.func @transform_3(%arg0: i32) -> (i32, i32) {
    %c0_i32 = arith.constant 0 : i32
    %c0_i32_0 = arith.constant 0 : i32
    %c0_i32_1 = arith.constant 0 : i32
    return %c0_i32, %c0_i32_0 : i32, i32
  }
  func.func @transform_4(%arg0: i32) -> (i32, i32) {
    %c0_i32 = arith.constant 0 : i32
    %c0_i32_0 = arith.constant 0 : i32
    %c0_i32_1 = arith.constant 0 : i32
    return %c0_i32, %c0_i32_0 : i32, i32
  }
  func.func @transform_5(%arg0: i32) -> (i32, i32) {
    %c0_i32 = arith.constant 0 : i32
    %c0_i32_0 = arith.constant 0 : i32
    %c0_i32_1 = arith.constant 0 : i32
    return %c0_i32, %c0_i32_0 : i32, i32
  }
  func.func @transform_6(%arg0: i32) -> (i32, i32) {
    %c0_i32 = arith.constant 0 : i32
    %c0_i32_0 = arith.constant 0 : i32
    %c0_i32_1 = arith.constant 0 : i32
    return %c0_i32, %c0_i32_0 : i32, i32
  }
  func.func @transform_7(%arg0: i32) -> (i32, i32) {
    %c0_i32 = arith.constant 0 : i32
    %c0_i32_0 = arith.constant 0 : i32
    %c0_i32_1 = arith.constant 0 : i32
    return %c0_i32, %c0_i32_0 : i32, i32
  }
  func.func @transform_8(%arg0: i32) -> (i32, i32) {
    %c0_i32 = arith.constant 0 : i32
    %c0_i32_0 = arith.constant 0 : i32
    %c0_i32_1 = arith.constant 0 : i32
    return %c0_i32, %c0_i32_0 : i32, i32
  }
  func.func @transform_9(%arg0: i32) -> (i32, i32) {
    %c0_i32 = arith.constant 0 : i32
    %c0_i32_0 = arith.constant 0 : i32
    %c0_i32_1 = arith.constant 0 : i32
    return %c0_i32, %c0_i32_0 : i32, i32
  }
  func.func @transform_10(%arg0: i32) -> (i32, i32) {
    %c0_i32 = arith.constant 0 : i32
    %c0_i32_0 = arith.constant 0 : i32
    return %arg0, %c0_i32 : i32, i32
  }
  func.func @transform_11(%arg0: i32) -> (i32, i32) {
    %c0_i32 = arith.constant 0 : i32
    %c0_i32_0 = arith.constant 0 : i32
    return %arg0, %c0_i32 : i32, i32
  }
  func.func @transform_12(%arg0: i32) -> (i32, i32) {
    %c0_i32 = arith.constant 0 : i32
    %c0_i32_0 = arith.constant 0 : i32
    return %arg0, %c0_i32 : i32, i32
  }
}

</mosaic_0001>

<bundles_post_ra>
// kernel: vae_forward.1
= control target key start
LH: loop header
LB: loop body
LE: loop exit
PB: predicated region body
PF: predicated region fallthrough
CT: control target
= control target key end

     0   :  { %vm1251_vm0 = vcmask 130048   ;;  %s7311_s2 = inlined_call_operand.vmem [shape: bf16[784,512], index: 2, kind: input, shape index: {}]   ;;  %s7312_s0 = inlined_call_operand.vmem [shape: f32[8,784], index: 0, kind: input, shape index: {}]   ;;  %s7313_s4 = inlined_call_operand.vmem [shape: bf16[512,256], index: 4, kind: input, shape index: {}]   ;;  %s7314_s6 = inlined_call_operand.vmem [shape: bf16[128,512], index: 6, kind: input, shape index: {}]   ;;  %s7315_s3 = inlined_call_operand.vmem [shape: f32[1,512], index: 3, kind: input, shape index: {}]   ;;  %s7316_s8 = inlined_call_operand.vmem [shape: bf16[512,784], index: 8, kind: input, shape index: {}]   ;;  %s7317_s5 = inlined_call_operand.vmem [shape: f32[1,256], index: 5, kind: input, shape index: {}]   ;;  %s7318_s11 = inlined_call_operand.vmem [shape: f32[8,128], index: 11, kind: output, shape index: {1}]   ;;  %s7319_s12 = inlined_call_operand.vmem [shape: f32[8,128], index: 12, kind: output, shape index: {2}]   ;;  %s7320_s1 = inlined_call_operand.vmem [shape: f32[8,128], index: 1, kind: input, shape index: {}]   ;;  %s7321_s7 = inlined_call_operand.vmem [shape: f32[1,512], index: 7, kind: input, shape index: {}]   ;;  %s7322_s9 = inlined_call_operand.vmem [shape: f32[1,784], index: 9, kind: input, shape index: {}]   ;;  %s7323_s10 = inlined_call_operand.vmem [shape: f32[8,784], index: 10, kind: output, shape index: {0}]  }
   0x1   :  { %v4794_v0 = vld [vmem:[%s7311_s2 + $0x4] ss:$16 sps:$4 sm:$0xff]   ;;  %v4796_v1 = vld [vmem:[%s7311_s2 + $0xc] ss:$16 sps:$4 sm:$0xff]   ;;  %v4798_v2 = vld [vmem:[%s7311_s2] ss:$16 sps:$4 sm:$0xff]  }
   0x2   :  { %1255 = vmatprep.subr.bf16.mxu0 %v4794_v0  ;;  %v4799_v3 = vld [vmem:[%s7311_s2 + $0x8] ss:$16 sps:$4 sm:$0xff]   ;;  %1419 = vmatprep.subr.bf16.mxu1 %v4796_v1  ;;  %v4800_v4 = vld [vmem:[%s7311_s2 + $0x24] ss:$16 sps:$4 sm:$0xff]   ;;  %v4802_v5 = vld [vmem:[%s7311_s2 + $0x2c] ss:$16 sps:$4 sm:$0xff]  }
   0x3   :  { %1256 = vmatpush1.bf16.msra.mxu0 %v4798_v2  ;;  %1420 = vmatpush1.bf16.msra.mxu1 %v4799_v3  ;;  %v4804_v6 = vld [vmem:[%s7311_s2 + $0x20] ss:$16 sps:$4 sm:$0xff]   ;;  %v4805_v7 = vld [vmem:[%s7311_s2 + $0x28] ss:$16 sps:$4 sm:$0xff]   ;;  %v4806_v8 = vld [vmem:[%s7311_s2 + $0x44] ss:$16 sps:$4 sm:$0xff]  }
   0x4   :  { %1257 = vmatprep.subr.bf16.mxu0 %v4800_v4  ;;  %1421 = vmatprep.subr.bf16.mxu1 %v4802_v5  ;;  %v4808_v9 = vld [vmem:[%s7311_s2 + $0x4c] ss:$16 sps:$4 sm:$0xff]   ;;  %v4810_v10 = vld [vmem:[%s7311_s2 + $0x40] ss:$16 sps:$4 sm:$0xff]   ;;  %v4811_v11 = vld [vmem:[%s7311_s2 + $0x48] ss:$16 sps:$4 sm:$0xff]  }
   0x5   :  { %v4812_v12 = vld [vmem:[%s7311_s2 + $0x64] ss:$16 sps:$4 sm:$0xff]   ;;  %v4814_v13 = vld [vmem:[%s7311_s2 + $0x6c] ss:$16 sps:$4 sm:$0xff]   ;;  %v4816_v14 = vld [vmem:[%s7311_s2 + $0x60] ss:$16 sps:$4 sm:$0xff]  }
   0x6   :  { %v4817_v15 = vld [vmem:[%s7311_s2 + $0x68] ss:$16 sps:$4 sm:$0xff]   ;;  %v4818_v16 = vld [vmem:[%s7311_s2 + $0x84] ss:$16 sps:$4 sm:$0xff]   ;;  %v4820_v17 = vld [vmem:[%s7311_s2 + $0x8c] ss:$16 sps:$4 sm:$0xff]  }
   0x7   :  { %1258 = vmatpush1.bf16.msra.mxu0 %v4804_v6  ;;  %1422 = vmatpush1.bf16.msra.mxu1 %v4805_v7  ;;  %v4822_v18 = vld [vmem:[%s7311_s2 + $0x80] ss:$16 sps:$4 sm:$0xff]   ;;  %v4823_v19 = vld [vmem:[%s7311_s2 + $0x88] ss:$16 sps:$4 sm:$0xff]   ;;  %v4824_v20 = vld [vmem:[%s7311_s2 + $0xa4] ss:$16 sps:$4 sm:$0xff]  }
   0x8   :  { %1259 = vmatprep.subr.bf16.mxu0 %v4806_v8  ;;  %1423 = vmatprep.subr.bf16.mxu1 %v4808_v9  ;;  %v4826_v21 = vld [vmem:[%s7311_s2 + $0xac] ss:$16 sps:$4 sm:$0xff]   ;;  %v4828_v22 = vld [vmem:[%s7311_s2 + $0xa0] ss:$16 sps:$4 sm:$0xff]   ;;  %v4829_v23 = vld [vmem:[%s7311_s2 + $0xa8] ss:$16 sps:$4 sm:$0xff]  }
   0x9   :  { %v4830_v24 = vld [vmem:[%s7311_s2 + $0xc4] ss:$16 sps:$4 sm:$0xff]   ;;  %v4832_v25 = vld [vmem:[%s7311_s2 + $0xcc] ss:$16 sps:$4 sm:$0xff]   ;;  %v4834_v26 = vld [vmem:[%s7311_s2 + $0xc0] ss:$16 sps:$4 sm:$0xff]  }
   0xa   :  { %v4835_v27 = vld [vmem:[%s7311_s2 + $0xc8] ss:$16 sps:$4 sm:$0xff]   ;;  %v4836_v28 = vld [vmem:[%s7311_s2 + $0xe4] ss:$16 sps:$4 sm:$0xff]   ;;  %v4838_v29 = vld [vmem:[%s7311_s2 + $0xec] ss:$16 sps:$4 sm:$0xff]  }
   0xb   :  { %1260 = vmatpush1.bf16.msra.mxu0 %v4810_v10  ;;  %1424 = vmatpush1.bf16.msra.mxu1 %v4811_v11  ;;  %v4840_v30 = vld [vmem:[%s7311_s2 + $0xe0] ss:$16 sps:$4 sm:$0xff]   ;;  %v4841_v31 = vld [vmem:[%s7311_s2 + $0xe8] ss:$16 sps:$4 sm:$0xff]   ;;  %v4842_v32 = vld [vmem:[%s7311_s2 + $0x104] ss:$16 sps:$4 sm:$0xff]  }
   0xc   :  { %1261 = vmatprep.subr.bf16.mxu0 %v4812_v12  ;;  %1425 = vmatprep.subr.bf16.mxu1 %v4814_v13  ;;  %v4844_v33 = vld [vmem:[%s7311_s2 + $0x10c] ss:$16 sps:$4 sm:$0xff]   ;;  %v4846_v34 = vld [vmem:[%s7311_s2 + $0x100] ss:$16 sps:$4 sm:$0xff]   ;;  %v4847_v35 = vld [vmem:[%s7311_s2 + $0x108] ss:$16 sps:$4 sm:$0xff]  }
   0xd   :  { %v4848_v36 = vld [vmem:[%s7311_s2 + $0x124] ss:$16 sps:$4 sm:$0xff]   ;;  %v4850_v37 = vld [vmem:[%s7311_s2 + $0x12c] ss:$16 sps:$4 sm:$0xff]   ;;  %v4852_v38 = vld [vmem:[%s7311_s2 + $0x120] ss:$16 sps:$4 sm:$0xff]  }
   0xe   :  { %v4853_v39 = vld [vmem:[%s7311_s2 + $0x128] ss:$16 sps:$4 sm:$0xff]   ;;  %v4854_v40 = vld [vmem:[%s7311_s2 + $0x144] ss:$16 sps:$4 sm:$0xff]   ;;  %v4856_v41 = vld [vmem:[%s7311_s2 + $0x14c] ss:$16 sps:$4 sm:$0xff]  }
   0xf   :  { %1262 = vmatpush1.bf16.msra.mxu0 %v4816_v14  ;;  %1426 = vmatpush1.bf16.msra.mxu1 %v4817_v15  ;;  %v4858_v42 = vld [vmem:[%s7311_s2 + $0x140] ss:$16 sps:$4 sm:$0xff]   ;;  %v4859_v43 = vld [vmem:[%s7311_s2 + $0x148] ss:$16 sps:$4 sm:$0xff]   ;;  %v4860_v44 = vld [vmem:[%s7311_s2 + $0x164] ss:$16 sps:$4 sm:$0xff]  }
  0x10   :  { %1263 = vmatprep.subr.bf16.mxu0 %v4818_v16  ;;  %1427 = vmatprep.subr.bf16.mxu1 %v4820_v17  ;;  %v4862_v45 = vld [vmem:[%s7311_s2 + $0x16c] ss:$16 sps:$4 sm:$0xff]   ;;  %v4864_v47 = vld [vmem:[%s7311_s2 + $0x160] ss:$16 sps:$4 sm:$0xff]   ;;  %v4865_v49 = vld [vmem:[%s7311_s2 + $0x168] ss:$16 sps:$4 sm:$0xff]  }
  0x11   :  { %v40_v46 = vld [vmem:[%s7312_s0 + $0x8] sm:$0xff]  ;;  %v4866_v50 = vld [vmem:[%s7311_s2 + $0x184] ss:$16 sps:$4 sm:$0xff]   ;;  %v4870_v52 = vld [vmem:[%s7311_s2 + $0x180] ss:$16 sps:$4 sm:$0xff]  }
  0x12   :  { %v47_v48 = vpack.c.bf16 %v40_v46, %v40_v46  ;;  %v4868_v51 = vld [vmem:[%s7311_s2 + $0x18c] ss:$16 sps:$4 sm:$0xff]   ;;  %v4871_v53 = vld [vmem:[%s7311_s2 + $0x188] ss:$16 sps:$4 sm:$0xff]   ;;  %v4872_v54 = vld [vmem:[%s7311_s2 + $0x1a4] ss:$16 sps:$4 sm:$0xff]  }
  0x13   :  { %1264 = vmatpush1.bf16.msra.mxu0 %v4822_v18  ;;  %1428 = vmatpush1.bf16.msra.mxu1 %v4823_v19  ;;  %v4874_v55 = vld [vmem:[%s7311_s2 + $0x1ac] ss:$16 sps:$4 sm:$0xff]   ;;  %v4876_v56 = vld [vmem:[%s7311_s2 + $0x1a0] ss:$16 sps:$4 sm:$0xff]   ;;  %v4877_v57 = vld [vmem:[%s7311_s2 + $0x1a8] ss:$16 sps:$4 sm:$0xff]  }
  0x14   :  { %1265 = vmatprep.subr.bf16.mxu0 %v4824_v20  ;;  %1429 = vmatprep.subr.bf16.mxu1 %v4826_v21  ;;  %v4878_v58 = vld [vmem:[%s7311_s2 + $0x1c4] ss:$16 sps:$4 sm:$0xff]   ;;  %v4880_v59 = vld [vmem:[%s7311_s2 + $0x1cc] ss:$16 sps:$4 sm:$0xff]   ;;  %v4882_v60 = vld [vmem:[%s7311_s2 + $0x1c0] ss:$16 sps:$4 sm:$0xff]  }
  0x15   :  { %1287 = vmatprep.mubr.bf16.mxu0 %v47_v48  ;;  %1451 = vmatprep.mubr.bf16.mxu1 %v47_v48  ;;  %v4883_v61 = vld [vmem:[%s7311_s2 + $0x1c8] ss:$16 sps:$4 sm:$0xff]   ;;  %v4884_v62 = vld [vmem:[%s7311_s2 + $0x1e4] ss:$16 sps:$4 sm:$0xff]   ;;  %v4886_v63 = vld [vmem:[%s7311_s2 + $0x1ec] ss:$16 sps:$4 sm:$0xff]  }
  0x16   :  { %v4888_v0 = vld [vmem:[%s7311_s2 + $0x1e0] ss:$16 sps:$4 sm:$0xff]   ;;  %v4889_v1 = vld [vmem:[%s7311_s2 + $0x1e8] ss:$16 sps:$4 sm:$0xff]   ;;  %v4892_v3 = vld [vmem:[%s7311_s2 + $0x204] ss:$16 sps:$4 sm:$0xff]  }
  0x17   :  { %1266 = vmatpush1.bf16.msra.mxu0 %v4828_v22  ;;  %1430 = vmatpush1.bf16.msra.mxu1 %v4829_v23  ;;  %v39_v2 = vld [vmem:[%s7312_s0] sm:$0xff]  ;;  %v4895_v4 = vld [vmem:[%s7311_s2 + $0x20c] ss:$16 sps:$4 sm:$0xff]   ;;  %v4893_v7 = vld [vmem:[%s7311_s2 + $0x208] ss:$16 sps:$4 sm:$0xff]  }
  0x18   :  { %1267 = vmatprep.subr.bf16.mxu0 %v4830_v24  ;;  %1431 = vmatprep.subr.bf16.mxu1 %v4832_v25  ;;  %v46_v5 = vpack.c.bf16 %v39_v2, %v39_v2  ;;  %v4890_v6 = vld [vmem:[%s7311_s2 + $0x200] ss:$16 sps:$4 sm:$0xff]   ;;  %v4898_v8 = vld [vmem:[%s7311_s2 + $0x224] ss:$16 sps:$4 sm:$0xff]   ;;  %v4901_v9 = vld [vmem:[%s7311_s2 + $0x22c] ss:$16 sps:$4 sm:$0xff]  }
  0x19   :  { %v4896_v10 = vld [vmem:[%s7311_s2 + $0x220] ss:$16 sps:$4 sm:$0xff]   ;;  %v4899_v11 = vld [vmem:[%s7311_s2 + $0x228] ss:$16 sps:$4 sm:$0xff]   ;;  %v4904_v12 = vld [vmem:[%s7311_s2 + $0x244] ss:$16 sps:$4 sm:$0xff]  }
  0x1a   :  { %v4907_v13 = vld [vmem:[%s7311_s2 + $0x24c] ss:$16 sps:$4 sm:$0xff]   ;;  %v4902_v14 = vld [vmem:[%s7311_s2 + $0x240] ss:$16 sps:$4 sm:$0xff]   ;;  %v4905_v15 = vld [vmem:[%s7311_s2 + $0x248] ss:$16 sps:$4 sm:$0xff]  }
  0x1b   :  { %1268 = vmatpush1.bf16.msra.mxu0 %v4834_v26  ;;  %1432 = vmatpush1.bf16.msra.mxu1 %v4835_v27  ;;  %v4910_v16 = vld [vmem:[%s7311_s2 + $0x264] ss:$16 sps:$4 sm:$0xff]   ;;  %v4913_v17 = vld [vmem:[%s7311_s2 + $0x26c] ss:$16 sps:$4 sm:$0xff]   ;;  %v4908_v18 = vld [vmem:[%s7311_s2 + $0x260] ss:$16 sps:$4 sm:$0xff]  }
  0x1c   :  { %1269 = vmatprep.subr.bf16.mxu0 %v4836_v28  ;;  %1433 = vmatprep.subr.bf16.mxu1 %v4838_v29  ;;  %v4911_v19 = vld [vmem:[%s7311_s2 + $0x268] ss:$16 sps:$4 sm:$0xff]   ;;  %v4916_v20 = vld [vmem:[%s7311_s2 + $0x284] ss:$16 sps:$4 sm:$0xff]   ;;  %v4919_v21 = vld [vmem:[%s7311_s2 + $0x28c] ss:$16 sps:$4 sm:$0xff]  }
  0x1d   :  { %v4914_v22 = vld [vmem:[%s7311_s2 + $0x280] ss:$16 sps:$4 sm:$0xff]   ;;  %v4917_v23 = vld [vmem:[%s7311_s2 + $0x288] ss:$16 sps:$4 sm:$0xff]   ;;  %v4922_v24 = vld [vmem:[%s7311_s2 + $0x2a4] ss:$16 sps:$4 sm:$0xff]  }
  0x1e   :  { %v4925_v25 = vld [vmem:[%s7311_s2 + $0x2ac] ss:$16 sps:$4 sm:$0xff]   ;;  %v4920_v26 = vld [vmem:[%s7311_s2 + $0x2a0] ss:$16 sps:$4 sm:$0xff]   ;;  %v4923_v27 = vld [vmem:[%s7311_s2 + $0x2a8] ss:$16 sps:$4 sm:$0xff]  }
  0x1f   :  { %1270 = vmatpush1.bf16.msra.mxu0 %v4840_v30  ;;  %1434 = vmatpush1.bf16.msra.mxu1 %v4841_v31  ;;  %v4928_v28 = vld [vmem:[%s7311_s2 + $0x2c4] ss:$16 sps:$4 sm:$0xff]   ;;  %v4931_v29 = vld [vmem:[%s7311_s2 + $0x2cc] ss:$16 sps:$4 sm:$0xff]   ;;  %v4926_v31 = vld [vmem:[%s7311_s2 + $0x2c0] ss:$16 sps:$4 sm:$0xff]  }
  0x20   :  { %1271 = vmatprep.subr.bf16.mxu0 %v4842_v32  ;;  %1435 = vmatprep.subr.bf16.mxu1 %v4844_v33  ;;  %v42_v30 = vld [vmem:[%s7312_s0 + $0x18] sm:$0xff]  ;;  %v4952_v46 = vld [vmem:[%s7311_s2 + $0x344] ss:$16 sps:$4 sm:$0xff]   ;;  %v4950_v48 = vld [vmem:[%s7311_s2 + $0x340] ss:$16 sps:$4 sm:$0xff]  }
  0x21   :  { %v49_v32 = vpack.c.bf16 %v42_v30, %v42_v30  ;;  %v4929_v33 = vld [vmem:[%s7311_s2 + $0x2c8] ss:$16 sps:$4 sm:$0xff]   ;;  %v4982_v2 = vld [vmem:[%s7311_s2 + $0x3e4] ss:$16 sps:$4 sm:$0xff]  }
  0x22   :  { %v5018_v30 = vld [vmem:[%s7311_s2 + $0x4a4] ss:$16 sps:$4 sm:$0xff]  }
  0x23   :  { %1272 = vmatpush1.bf16.msra.mxu0 %v4846_v34  ;;  %1436 = vmatpush1.bf16.msra.mxu1 %v4847_v35  ;;  %v4934_v34 = vld [vmem:[%s7311_s2 + $0x2e4] ss:$16 sps:$4 sm:$0xff]   ;;  %v4937_v35 = vld [vmem:[%s7311_s2 + $0x2ec] ss:$16 sps:$4 sm:$0xff]  }
  0x24   :  { %1273 = vmatprep.subr.bf16.mxu0 %v4848_v36  ;;  %1437 = vmatprep.subr.bf16.mxu1 %v4850_v37  ;;  %v4932_v36 = vld [vmem:[%s7311_s2 + $0x2e0] ss:$16 sps:$4 sm:$0xff]   ;;  %v4935_v37 = vld [vmem:[%s7311_s2 + $0x2e8] ss:$16 sps:$4 sm:$0xff]  }
  0x27   :  { %1274 = vmatpush1.bf16.msra.mxu0 %v4852_v38  ;;  %1438 = vmatpush1.bf16.msra.mxu1 %v4853_v39  ;;  %v4940_v38 = vld [vmem:[%s7311_s2 + $0x304] ss:$16 sps:$4 sm:$0xff]   ;;  %v4943_v39 = vld [vmem:[%s7311_s2 + $0x30c] ss:$16 sps:$4 sm:$0xff]  }
  0x28   :  { %1275 = vmatprep.subr.bf16.mxu0 %v4854_v40  ;;  %1439 = vmatprep.subr.bf16.mxu1 %v4856_v41  ;;  %v4938_v40 = vld [vmem:[%s7311_s2 + $0x300] ss:$16 sps:$4 sm:$0xff]   ;;  %v4941_v41 = vld [vmem:[%s7311_s2 + $0x308] ss:$16 sps:$4 sm:$0xff]  }
  0x2b   :  { %1276 = vmatpush1.bf16.msra.mxu0 %v4858_v42  ;;  %1440 = vmatpush1.bf16.msra.mxu1 %v4859_v43  ;;  %v4946_v42 = vld [vmem:[%s7311_s2 + $0x324] ss:$16 sps:$4 sm:$0xff]   ;;  %v4949_v43 = vld [vmem:[%s7311_s2 + $0x32c] ss:$16 sps:$4 sm:$0xff]  }
  0x2c   :  { %1277 = vmatprep.subr.bf16.mxu0 %v4860_v44  ;;  %1441 = vmatprep.subr.bf16.mxu1 %v4862_v45  ;;  %v4944_v44 = vld [vmem:[%s7311_s2 + $0x320] ss:$16 sps:$4 sm:$0xff]   ;;  %v4947_v45 = vld [vmem:[%s7311_s2 + $0x328] ss:$16 sps:$4 sm:$0xff]  }
  0x2f   :  { %1278 = vmatpush1.bf16.msra.mxu0 %v4864_v47  ;;  %1442 = vmatpush1.bf16.msra.mxu1 %v4865_v49  ;;  %v4955_v47 = vld [vmem:[%s7311_s2 + $0x34c] ss:$16 sps:$4 sm:$0xff]   ;;  %v4953_v49 = vld [vmem:[%s7311_s2 + $0x348] ss:$16 sps:$4 sm:$0xff]  }
  0x30   :  { %1279 = vmatprep.subr.bf16.mxu0 %v4866_v50  ;;  %1443 = vmatprep.subr.bf16.mxu1 %v4868_v51  ;;  %v4958_v50 = vld [vmem:[%s7311_s2 + $0x364] ss:$16 sps:$4 sm:$0xff]   ;;  %v4961_v51 = vld [vmem:[%s7311_s2 + $0x36c] ss:$16 sps:$4 sm:$0xff]  }
  0x33   :  { %1280 = vmatpush1.bf16.msra.mxu0 %v4870_v52  ;;  %1444 = vmatpush1.bf16.msra.mxu1 %v4871_v53  ;;  %v4956_v52 = vld [vmem:[%s7311_s2 + $0x360] ss:$16 sps:$4 sm:$0xff]   ;;  %v4959_v53 = vld [vmem:[%s7311_s2 + $0x368] ss:$16 sps:$4 sm:$0xff]  }
  0x34   :  { %1281 = vmatprep.subr.bf16.mxu0 %v4872_v54  ;;  %1445 = vmatprep.subr.bf16.mxu1 %v4874_v55  ;;  %v4964_v54 = vld [vmem:[%s7311_s2 + $0x384] ss:$16 sps:$4 sm:$0xff]   ;;  %v4967_v55 = vld [vmem:[%s7311_s2 + $0x38c] ss:$16 sps:$4 sm:$0xff]  }
  0x37   :  { %1282 = vmatpush1.bf16.msra.mxu0 %v4876_v56  ;;  %1446 = vmatpush1.bf16.msra.mxu1 %v4877_v57  ;;  %v4962_v56 = vld [vmem:[%s7311_s2 + $0x380] ss:$16 sps:$4 sm:$0xff]   ;;  %v4965_v57 = vld [vmem:[%s7311_s2 + $0x388] ss:$16 sps:$4 sm:$0xff]  }
  0x38   :  { %1283 = vmatprep.subr.bf16.mxu0 %v4878_v58  ;;  %1447 = vmatprep.subr.bf16.mxu1 %v4880_v59  ;;  %v4970_v58 = vld [vmem:[%s7311_s2 + $0x3a4] ss:$16 sps:$4 sm:$0xff]   ;;  %v4973_v59 = vld [vmem:[%s7311_s2 + $0x3ac] ss:$16 sps:$4 sm:$0xff]  }
  0x3b   :  { %1284 = vmatpush1.bf16.msra.mxu0 %v4882_v60  ;;  %1448 = vmatpush1.bf16.msra.mxu1 %v4883_v61  ;;  %v4968_v60 = vld [vmem:[%s7311_s2 + $0x3a0] ss:$16 sps:$4 sm:$0xff]   ;;  %v4971_v61 = vld [vmem:[%s7311_s2 + $0x3a8] ss:$16 sps:$4 sm:$0xff]  }
  0x3c   :  { %1285 = vmatprep.subr.bf16.mxu0 %v4884_v62  ;;  %1449 = vmatprep.subr.bf16.mxu1 %v4886_v63  ;;  %v4976_v62 = vld [vmem:[%s7311_s2 + $0x3c4] ss:$16 sps:$4 sm:$0xff]   ;;  %v4979_v63 = vld [vmem:[%s7311_s2 + $0x3cc] ss:$16 sps:$4 sm:$0xff]  }
  0x3f   :  { %1286 = vmatpush1.bf16.msra.mxu0 %v4888_v0  ;;  %1450 = vmatpush1.bf16.msra.mxu1 %v4889_v1  ;;  %v4974_v0 = vld [vmem:[%s7311_s2 + $0x3c0] ss:$16 sps:$4 sm:$0xff]   ;;  %v4977_v1 = vld [vmem:[%s7311_s2 + $0x3c8] ss:$16 sps:$4 sm:$0xff]  }
  0x40   :  { %1296 = vmatprep.subr.bf16.mxu0 %v4892_v3  ;;  %1460 = vmatprep.subr.bf16.mxu1 %v4895_v4  ;;  %v4985_v3 = vld [vmem:[%s7311_s2 + $0x3ec] ss:$16 sps:$4 sm:$0xff]   ;;  %v4980_v4 = vld [vmem:[%s7311_s2 + $0x3e0] ss:$16 sps:$4 sm:$0xff]  }
  0x42   :  { %1288 = vmatmul.mubr.bf16.vlgmr.msra.gmra.mrb[0].mxu0 %v46_v5  ;;  %1452 = vmatmul.mubr.bf16.vlgmr.msra.gmra.mrb[0].mxu1 %v46_v5  ;;  %v4983_v5 = vld [vmem:[%s7311_s2 + $0x3e8] ss:$16 sps:$4 sm:$0xff]  }
  0x43   :  { %1297 = vmatpush1.bf16.msra.mxu0 %v4890_v6  ;;  %1461 = vmatpush1.bf16.msra.mxu1 %v4893_v7  ;;  %v4988_v6 = vld [vmem:[%s7311_s2 + $0x404] ss:$16 sps:$4 sm:$0xff]  }
  0x44   :  { %1298 = vmatprep.subr.bf16.mxu0 %v4898_v8  ;;  %1462 = vmatprep.subr.bf16.mxu1 %v4901_v9  ;;  %v41_v7 = vld [vmem:[%s7312_s0 + $0x10] sm:$0xff]  ;;  %v4991_v8 = vld [vmem:[%s7311_s2 + $0x40c] ss:$16 sps:$4 sm:$0xff]  }
  0x45   :  { %1328 = vmatprep.mubr.bf16.mxu0 %v49_v32  ;;  %1492 = vmatprep.mubr.bf16.mxu1 %v49_v32  ;;  %v4986_v9 = vld [vmem:[%s7311_s2 + $0x400] ss:$16 sps:$4 sm:$0xff]  }
  0x46   :  { %v5016_v32 = vld [vmem:[%s7311_s2 + $0x4a0] ss:$16 sps:$4 sm:$0xff]  }
  0x47   :  { %1299 = vmatpush1.bf16.msra.mxu0 %v4896_v10  ;;  %1463 = vmatpush1.bf16.msra.mxu1 %v4899_v11  ;;  %v48_v10 = vpack.c.bf16 %v41_v7, %v41_v7  ;;  %v4989_v11 = vld [vmem:[%s7311_s2 + $0x408] ss:$16 sps:$4 sm:$0xff]   ;;  %v5081_v7 = vld [vmem:[%s7311_s2 + $0x5ec] ss:$16 sps:$4 sm:$0xff]  }
  0x48   :  { %1300 = vmatprep.subr.bf16.mxu0 %v4904_v12  ;;  %1464 = vmatprep.subr.bf16.mxu1 %v4907_v13  ;;  %v4994_v12 = vld [vmem:[%s7311_s2 + $0x424] ss:$16 sps:$4 sm:$0xff]   ;;  %v4997_v13 = vld [vmem:[%s7311_s2 + $0x42c] ss:$16 sps:$4 sm:$0xff]  }
  0x4b   :  { %1301 = vmatpush1.bf16.msra.mxu0 %v4902_v14  ;;  %1465 = vmatpush1.bf16.msra.mxu1 %v4905_v15  ;;  %v44_v14 = vld [vmem:[%s7312_s0 + $0x28] sm:$0xff] }
  0x4c   :  { %1302 = vmatprep.subr.bf16.mxu0 %v4910_v16  ;;  %1466 = vmatprep.subr.bf16.mxu1 %v4913_v17  ;;  %v51_v15 = vpack.c.bf16 %v44_v14, %v44_v14  ;;  %v4992_v16 = vld [vmem:[%s7311_s2 + $0x420] ss:$16 sps:$4 sm:$0xff]   ;;  %v4995_v17 = vld [vmem:[%s7311_s2 + $0x428] ss:$16 sps:$4 sm:$0xff]  }
  0x4d   :  { %v5082_v14 = vld [vmem:[%s7311_s2 + $0x600] ss:$16 sps:$4 sm:$0xff]  }
  0x4f   :  { %1303 = vmatpush1.bf16.msra.mxu0 %v4908_v18  ;;  %1467 = vmatpush1.bf16.msra.mxu1 %v4911_v19  ;;  %v5000_v18 = vld [vmem:[%s7311_s2 + $0x444] ss:$16 sps:$4 sm:$0xff]   ;;  %v5003_v19 = vld [vmem:[%s7311_s2 + $0x44c] ss:$16 sps:$4 sm:$0xff]  }
  0x50   :  { %1304 = vmatprep.subr.bf16.mxu0 %v4916_v20  ;;  %1468 = vmatprep.subr.bf16.mxu1 %v4919_v21  ;;  %v4998_v20 = vld [vmem:[%s7311_s2 + $0x440] ss:$16 sps:$4 sm:$0xff]   ;;  %v5001_v21 = vld [vmem:[%s7311_s2 + $0x448] ss:$16 sps:$4 sm:$0xff]  }
  0x53   :  { %1305 = vmatpush1.bf16.msra.mxu0 %v4914_v22  ;;  %1469 = vmatpush1.bf16.msra.mxu1 %v4917_v23  ;;  %v5006_v22 = vld [vmem:[%s7311_s2 + $0x464] ss:$16 sps:$4 sm:$0xff]   ;;  %v5009_v23 = vld [vmem:[%s7311_s2 + $0x46c] ss:$16 sps:$4 sm:$0xff]  }
  0x54   :  { %1306 = vmatprep.subr.bf16.mxu0 %v4922_v24  ;;  %1470 = vmatprep.subr.bf16.mxu1 %v4925_v25  ;;  %v5004_v24 = vld [vmem:[%s7311_s2 + $0x460] ss:$16 sps:$4 sm:$0xff]   ;;  %v5007_v25 = vld [vmem:[%s7311_s2 + $0x468] ss:$16 sps:$4 sm:$0xff]  }
  0x57   :  { %1307 = vmatpush1.bf16.msra.mxu0 %v4920_v26  ;;  %1471 = vmatpush1.bf16.msra.mxu1 %v4923_v27  ;;  %v5012_v26 = vld [vmem:[%s7311_s2 + $0x484] ss:$16 sps:$4 sm:$0xff]   ;;  %v5015_v27 = vld [vmem:[%s7311_s2 + $0x48c] ss:$16 sps:$4 sm:$0xff]  }
  0x58   :  { %1308 = vmatprep.subr.bf16.mxu0 %v4928_v28  ;;  %1472 = vmatprep.subr.bf16.mxu1 %v4931_v29  ;;  %v5010_v28 = vld [vmem:[%s7311_s2 + $0x480] ss:$16 sps:$4 sm:$0xff]   ;;  %v5013_v29 = vld [vmem:[%s7311_s2 + $0x488] ss:$16 sps:$4 sm:$0xff]  }
  0x5b   :  { %1309 = vmatpush1.bf16.msra.mxu0 %v4926_v31  ;;  %1473 = vmatpush1.bf16.msra.mxu1 %v4929_v33  ;;  %v5021_v31 = vld [vmem:[%s7311_s2 + $0x4ac] ss:$16 sps:$4 sm:$0xff]   ;;  %v5019_v33 = vld [vmem:[%s7311_s2 + $0x4a8] ss:$16 sps:$4 sm:$0xff]  }
  0x5c   :  { %1310 = vmatprep.subr.bf16.mxu0 %v4934_v34  ;;  %1474 = vmatprep.subr.bf16.mxu1 %v4937_v35  ;;  %v5024_v34 = vld [vmem:[%s7311_s2 + $0x4c4] ss:$16 sps:$4 sm:$0xff]   ;;  %v5027_v35 = vld [vmem:[%s7311_s2 + $0x4cc] ss:$16 sps:$4 sm:$0xff]  }
  0x5f   :  { %1311 = vmatpush1.bf16.msra.mxu0 %v4932_v36  ;;  %1475 = vmatpush1.bf16.msra.mxu1 %v4935_v37  ;;  %v5022_v36 = vld [vmem:[%s7311_s2 + $0x4c0] ss:$16 sps:$4 sm:$0xff]   ;;  %v5025_v37 = vld [vmem:[%s7311_s2 + $0x4c8] ss:$16 sps:$4 sm:$0xff]  }
  0x60   :  { %1312 = vmatprep.subr.bf16.mxu0 %v4940_v38  ;;  %1476 = vmatprep.subr.bf16.mxu1 %v4943_v39  ;;  %v5030_v38 = vld [vmem:[%s7311_s2 + $0x4e4] ss:$16 sps:$4 sm:$0xff]   ;;  %v5033_v39 = vld [vmem:[%s7311_s2 + $0x4ec] ss:$16 sps:$4 sm:$0xff]  }
  0x63   :  { %1313 = vmatpush1.bf16.msra.mxu0 %v4938_v40  ;;  %1477 = vmatpush1.bf16.msra.mxu1 %v4941_v41  ;;  %v5028_v40 = vld [vmem:[%s7311_s2 + $0x4e0] ss:$16 sps:$4 sm:$0xff]   ;;  %v5031_v41 = vld [vmem:[%s7311_s2 + $0x4e8] ss:$16 sps:$4 sm:$0xff]  }
  0x64   :  { %1314 = vmatprep.subr.bf16.mxu0 %v4946_v42  ;;  %1478 = vmatprep.subr.bf16.mxu1 %v4949_v43  ;;  %v5036_v42 = vld [vmem:[%s7311_s2 + $0x504] ss:$16 sps:$4 sm:$0xff]   ;;  %v5039_v43 = vld [vmem:[%s7311_s2 + $0x50c] ss:$16 sps:$4 sm:$0xff]  }
  0x67   :  { %1315 = vmatpush1.bf16.msra.mxu0 %v4944_v44  ;;  %1479 = vmatpush1.bf16.msra.mxu1 %v4947_v45  ;;  %v5034_v44 = vld [vmem:[%s7311_s2 + $0x500] ss:$16 sps:$4 sm:$0xff]   ;;  %v5037_v45 = vld [vmem:[%s7311_s2 + $0x508] ss:$16 sps:$4 sm:$0xff]  }
  0x68   :  { %1316 = vmatprep.subr.bf16.mxu0 %v4952_v46  ;;  %1480 = vmatprep.subr.bf16.mxu1 %v4955_v47  ;;  %v5042_v46 = vld [vmem:[%s7311_s2 + $0x524] ss:$16 sps:$4 sm:$0xff]   ;;  %v5045_v47 = vld [vmem:[%s7311_s2 + $0x52c] ss:$16 sps:$4 sm:$0xff]  }
  0x6b   :  { %1317 = vmatpush1.bf16.msra.mxu0 %v4950_v48  ;;  %1481 = vmatpush1.bf16.msra.mxu1 %v4953_v49  ;;  %v5040_v48 = vld [vmem:[%s7311_s2 + $0x520] ss:$16 sps:$4 sm:$0xff]   ;;  %v5043_v49 = vld [vmem:[%s7311_s2 + $0x528] ss:$16 sps:$4 sm:$0xff]  }
  0x6c   :  { %1318 = vmatprep.subr.bf16.mxu0 %v4958_v50  ;;  %1482 = vmatprep.subr.bf16.mxu1 %v4961_v51  ;;  %v5048_v50 = vld [vmem:[%s7311_s2 + $0x544] ss:$16 sps:$4 sm:$0xff]   ;;  %v5051_v51 = vld [vmem:[%s7311_s2 + $0x54c] ss:$16 sps:$4 sm:$0xff]  }
  0x6f   :  { %1319 = vmatpush1.bf16.msra.mxu0 %v4956_v52  ;;  %1483 = vmatpush1.bf16.msra.mxu1 %v4959_v53  ;;  %v5046_v52 = vld [vmem:[%s7311_s2 + $0x540] ss:$16 sps:$4 sm:$0xff]   ;;  %v5049_v53 = vld [vmem:[%s7311_s2 + $0x548] ss:$16 sps:$4 sm:$0xff]  }
  0x70   :  { %1320 = vmatprep.subr.bf16.mxu0 %v4964_v54  ;;  %1484 = vmatprep.subr.bf16.mxu1 %v4967_v55  ;;  %v5054_v54 = vld [vmem:[%s7311_s2 + $0x564] ss:$16 sps:$4 sm:$0xff]   ;;  %v5057_v55 = vld [vmem:[%s7311_s2 + $0x56c] ss:$16 sps:$4 sm:$0xff]  }
  0x73   :  { %1321 = vmatpush1.bf16.msra.mxu0 %v4962_v56  ;;  %1485 = vmatpush1.bf16.msra.mxu1 %v4965_v57  ;;  %v5052_v56 = vld [vmem:[%s7311_s2 + $0x560] ss:$16 sps:$4 sm:$0xff]   ;;  %v5055_v57 = vld [vmem:[%s7311_s2 + $0x568] ss:$16 sps:$4 sm:$0xff]  }
  0x74   :  { %1322 = vmatprep.subr.bf16.mxu0 %v4970_v58  ;;  %1486 = vmatprep.subr.bf16.mxu1 %v4973_v59  ;;  %v5060_v58 = vld [vmem:[%s7311_s2 + $0x584] ss:$16 sps:$4 sm:$0xff]   ;;  %v5063_v59 = vld [vmem:[%s7311_s2 + $0x58c] ss:$16 sps:$4 sm:$0xff]  }
  0x77   :  { %1323 = vmatpush1.bf16.msra.mxu0 %v4968_v60  ;;  %1487 = vmatpush1.bf16.msra.mxu1 %v4971_v61  ;;  %v5058_v60 = vld [vmem:[%s7311_s2 + $0x580] ss:$16 sps:$4 sm:$0xff]   ;;  %v5061_v61 = vld [vmem:[%s7311_s2 + $0x588] ss:$16 sps:$4 sm:$0xff]  }
  0x78   :  { %1324 = vmatprep.subr.bf16.mxu0 %v4976_v62  ;;  %1488 = vmatprep.subr.bf16.mxu1 %v4979_v63  ;;  %v5066_v62 = vld [vmem:[%s7311_s2 + $0x5a4] ss:$16 sps:$4 sm:$0xff]   ;;  %v5069_v63 = vld [vmem:[%s7311_s2 + $0x5ac] ss:$16 sps:$4 sm:$0xff]  }
  0x7b   :  { %1325 = vmatpush1.bf16.msra.mxu0 %v4974_v0  ;;  %1489 = vmatpush1.bf16.msra.mxu1 %v4977_v1  ;;  %v5064_v0 = vld [vmem:[%s7311_s2 + $0x5a0] ss:$16 sps:$4 sm:$0xff]   ;;  %v5067_v1 = vld [vmem:[%s7311_s2 + $0x5a8] ss:$16 sps:$4 sm:$0xff]  }
  0x7c   :  { %1326 = vmatprep.subr.bf16.mxu0 %v4982_v2  ;;  %1490 = vmatprep.subr.bf16.mxu1 %v4985_v3  ;;  %v5072_v2 = vld [vmem:[%s7311_s2 + $0x5c4] ss:$16 sps:$4 sm:$0xff]   ;;  %v5075_v3 = vld [vmem:[%s7311_s2 + $0x5cc] ss:$16 sps:$4 sm:$0xff]  }
  0x7f   :  { %1327 = vmatpush1.bf16.msra.mxu0 %v4980_v4  ;;  %1491 = vmatpush1.bf16.msra.mxu1 %v4983_v5  ;;  %v5070_v4 = vld [vmem:[%s7311_s2 + $0x5c0] ss:$16 sps:$4 sm:$0xff]   ;;  %v5073_v5 = vld [vmem:[%s7311_s2 + $0x5c8] ss:$16 sps:$4 sm:$0xff]  }
  0x80   :  { %1337 = vmatprep.subr.bf16.mxu0 %v4988_v6  ;;  %1501 = vmatprep.subr.bf16.mxu1 %v4991_v8  ;;  %v5078_v6 = vld [vmem:[%s7311_s2 + $0x5e4] ss:$16 sps:$4 sm:$0xff]   ;;  %v5076_v8 = vld [vmem:[%s7311_s2 + $0x5e0] ss:$16 sps:$4 sm:$0xff]  }
  0x82   :  { %1329 = vmatmul.mubr.bf16.vlgmr.msra.gmra.mrb[0].mxu0 %v48_v10  ;;  %1493 = vmatmul.mubr.bf16.vlgmr.msra.gmra.mrb[0].mxu1 %v48_v10  ;;  %v43_v10 = vld [vmem:[%s7312_s0 + $0x20] sm:$0xff] }
  0x83   :  { %1338 = vmatpush1.bf16.msra.mxu0 %v4986_v9  ;;  %1502 = vmatpush1.bf16.msra.mxu1 %v4989_v11  ;;  %v5079_v9 = vld [vmem:[%s7311_s2 + $0x5e8] ss:$16 sps:$4 sm:$0xff]   ;;  %v5084_v11 = vld [vmem:[%s7311_s2 + $0x604] ss:$16 sps:$4 sm:$0xff]  }
  0x84   :  { %1339 = vmatprep.subr.bf16.mxu0 %v4994_v12  ;;  %1503 = vmatprep.subr.bf16.mxu1 %v4997_v13  ;;  %v5087_v12 = vld [vmem:[%s7311_s2 + $0x60c] ss:$16 sps:$4 sm:$0xff]   ;;  %v50_v13 = vpack.c.bf16 %v43_v10, %v43_v10 }
  0x85   :  { %1369 = vmatprep.mubr.bf16.mxu0 %v51_v15  ;;  %1533 = vmatprep.mubr.bf16.mxu1 %v51_v15  ;;  %v5085_v15 = vld [vmem:[%s7311_s2 + $0x608] ss:$16 sps:$4 sm:$0xff]  }
  0x87   :  { %1340 = vmatpush1.bf16.msra.mxu0 %v4992_v16  ;;  %1504 = vmatpush1.bf16.msra.mxu1 %v4995_v17  ;;  %v5090_v16 = vld [vmem:[%s7313_s4 + $0x4] ss:$8 sps:$4 sm:$0xff]   ;;  %v5554_v17 = vmov 0  }
  0x88   :  { %1341 = vmatprep.subr.bf16.mxu0 %v5000_v18  ;;  %1505 = vmatprep.subr.bf16.mxu1 %v5003_v19  ;;  %v45_v18 = vld [vmem:[%s7312_s0 + $0x30] sm:$0xff] }
  0x89   :  { %v52_v19 = vpack.c.bf16 %v45_v18, %v45_v18 }
  0x8b   :  { %1342 = vmatpush1.bf16.msra.mxu0 %v4998_v20  ;;  %1506 = vmatpush1.bf16.msra.mxu1 %v5001_v21  ;;  %v5088_v20 = vld [vmem:[%s7313_s4] ss:$8 sps:$4 sm:$0xff]   ;;  %v5093_v21 = vld [vmem:[%s7313_s4 + $0x14] ss:$8 sps:$4 sm:$0xff]  }
  0x8c   :  { %1343 = vmatprep.subr.bf16.mxu0 %v5006_v22  ;;  %1507 = vmatprep.subr.bf16.mxu1 %v5009_v23  ;;  %v5091_v22 = vld [vmem:[%s7313_s4 + $0x10] ss:$8 sps:$4 sm:$0xff]   ;;  %v5096_v23 = vld [vmem:[%s7313_s4 + $0x24] ss:$8 sps:$4 sm:$0xff]  }
  0x8f   :  { %1344 = vmatpush1.bf16.msra.mxu0 %v5004_v24  ;;  %1508 = vmatpush1.bf16.msra.mxu1 %v5007_v25  ;;  %v5094_v24 = vld [vmem:[%s7313_s4 + $0x20] ss:$8 sps:$4 sm:$0xff]   ;;  %v5099_v25 = vld [vmem:[%s7313_s4 + $0x34] ss:$8 sps:$4 sm:$0xff]  }
  0x90   :  { %1345 = vmatprep.subr.bf16.mxu0 %v5012_v26  ;;  %1509 = vmatprep.subr.bf16.mxu1 %v5015_v27  ;;  %v5097_v26 = vld [vmem:[%s7313_s4 + $0x30] ss:$8 sps:$4 sm:$0xff]   ;;  %v5102_v27 = vld [vmem:[%s7313_s4 + $0x44] ss:$8 sps:$4 sm:$0xff]  }
  0x93   :  { %1346 = vmatpush1.bf16.msra.mxu0 %v5010_v28  ;;  %1510 = vmatpush1.bf16.msra.mxu1 %v5013_v29  ;;  %v5100_v28 = vld [vmem:[%s7313_s4 + $0x40] ss:$8 sps:$4 sm:$0xff]   ;;  %v5105_v29 = vld [vmem:[%s7313_s4 + $0x54] ss:$8 sps:$4 sm:$0xff]  }
  0x94   :  { %1347 = vmatprep.subr.bf16.mxu0 %v5018_v30  ;;  %1511 = vmatprep.subr.bf16.mxu1 %v5021_v31  ;;  %v5103_v30 = vld [vmem:[%s7313_s4 + $0x50] ss:$8 sps:$4 sm:$0xff]   ;;  %v5108_v31 = vld [vmem:[%s7313_s4 + $0x64] ss:$8 sps:$4 sm:$0xff]  }
  0x97   :  { %1348 = vmatpush1.bf16.msra.mxu0 %v5016_v32  ;;  %1512 = vmatpush1.bf16.msra.mxu1 %v5019_v33  ;;  %v5106_v32 = vld [vmem:[%s7313_s4 + $0x60] ss:$8 sps:$4 sm:$0xff]   ;;  %v5111_v33 = vld [vmem:[%s7313_s4 + $0x74] ss:$8 sps:$4 sm:$0xff]  }
  0x98   :  { %1349 = vmatprep.subr.bf16.mxu0 %v5024_v34  ;;  %1513 = vmatprep.subr.bf16.mxu1 %v5027_v35  ;;  %v5109_v34 = vld [vmem:[%s7313_s4 + $0x70] ss:$8 sps:$4 sm:$0xff]   ;;  %v5114_v35 = vld [vmem:[%s7313_s4 + $0x84] ss:$8 sps:$4 sm:$0xff]  }
  0x9b   :  { %1350 = vmatpush1.bf16.msra.mxu0 %v5022_v36  ;;  %1514 = vmatpush1.bf16.msra.mxu1 %v5025_v37  ;;  %v5112_v36 = vld [vmem:[%s7313_s4 + $0x80] ss:$8 sps:$4 sm:$0xff]   ;;  %v5117_v37 = vld [vmem:[%s7313_s4 + $0x94] ss:$8 sps:$4 sm:$0xff]  }
  0x9c   :  { %1351 = vmatprep.subr.bf16.mxu0 %v5030_v38  ;;  %1515 = vmatprep.subr.bf16.mxu1 %v5033_v39  ;;  %v5115_v38 = vld [vmem:[%s7313_s4 + $0x90] ss:$8 sps:$4 sm:$0xff]   ;;  %v5120_v39 = vld [vmem:[%s7313_s4 + $0xa4] ss:$8 sps:$4 sm:$0xff]  }
  0x9f   :  { %1352 = vmatpush1.bf16.msra.mxu0 %v5028_v40  ;;  %1516 = vmatpush1.bf16.msra.mxu1 %v5031_v41  ;;  %v5118_v40 = vld [vmem:[%s7313_s4 + $0xa0] ss:$8 sps:$4 sm:$0xff]   ;;  %v5123_v41 = vld [vmem:[%s7313_s4 + $0xb4] ss:$8 sps:$4 sm:$0xff]  }
  0xa0   :  { %1353 = vmatprep.subr.bf16.mxu0 %v5036_v42  ;;  %1517 = vmatprep.subr.bf16.mxu1 %v5039_v43  ;;  %v5121_v42 = vld [vmem:[%s7313_s4 + $0xb0] ss:$8 sps:$4 sm:$0xff]   ;;  %v5126_v43 = vld [vmem:[%s7313_s4 + $0xc4] ss:$8 sps:$4 sm:$0xff]  }
  0xa3   :  { %1354 = vmatpush1.bf16.msra.mxu0 %v5034_v44  ;;  %1518 = vmatpush1.bf16.msra.mxu1 %v5037_v45  ;;  %v5124_v44 = vld [vmem:[%s7313_s4 + $0xc0] ss:$8 sps:$4 sm:$0xff]   ;;  %v5129_v45 = vld [vmem:[%s7313_s4 + $0xd4] ss:$8 sps:$4 sm:$0xff]  }
  0xa4   :  { %1355 = vmatprep.subr.bf16.mxu0 %v5042_v46  ;;  %1519 = vmatprep.subr.bf16.mxu1 %v5045_v47  ;;  %v5127_v46 = vld [vmem:[%s7313_s4 + $0xd0] ss:$8 sps:$4 sm:$0xff]   ;;  %v5132_v47 = vld [vmem:[%s7313_s4 + $0xe4] ss:$8 sps:$4 sm:$0xff]  }
  0xa7   :  { %1356 = vmatpush1.bf16.msra.mxu0 %v5040_v48  ;;  %1520 = vmatpush1.bf16.msra.mxu1 %v5043_v49  ;;  %v5130_v48 = vld [vmem:[%s7313_s4 + $0xe0] ss:$8 sps:$4 sm:$0xff]   ;;  %v5135_v49 = vld [vmem:[%s7313_s4 + $0xf4] ss:$8 sps:$4 sm:$0xff]  }
  0xa8   :  { %1357 = vmatprep.subr.bf16.mxu0 %v5048_v50  ;;  %1521 = vmatprep.subr.bf16.mxu1 %v5051_v51  ;;  %v5133_v50 = vld [vmem:[%s7313_s4 + $0xf0] ss:$8 sps:$4 sm:$0xff]   ;;  %v5138_v51 = vld [vmem:[%s7313_s4 + $0x104] ss:$8 sps:$4 sm:$0xff]  }
  0xab   :  { %1358 = vmatpush1.bf16.msra.mxu0 %v5046_v52  ;;  %1522 = vmatpush1.bf16.msra.mxu1 %v5049_v53  ;;  %v5184_v52 = vld [vmem:[%s7314_s6] ss:$16 sps:$4 sm:$0xff]   ;;  %v5186_v53 = vld [vmem:[%s7314_s6 + $0x4] ss:$16 sps:$4 sm:$0xff]  }
  0xac   :  { %1359 = vmatprep.subr.bf16.mxu0 %v5054_v54  ;;  %1523 = vmatprep.subr.bf16.mxu1 %v5057_v55  ;;  %v5187_v54 = vld [vmem:[%s7314_s6 + $0x20] ss:$16 sps:$4 sm:$0xff]   ;;  %v5189_v55 = vld [vmem:[%s7314_s6 + $0x24] ss:$16 sps:$4 sm:$0xff]  }
  0xaf   :  { %1360 = vmatpush1.bf16.msra.mxu0 %v5052_v56  ;;  %1524 = vmatpush1.bf16.msra.mxu1 %v5055_v57  ;;  %v251_v56 = vlaneseq }
  0xb0   :  { %1361 = vmatprep.subr.bf16.mxu0 %v5060_v58  ;;  %1525 = vmatprep.subr.bf16.mxu1 %v5063_v59  ;;  %v6353_v59 = vld [vmem:[%s7315_s3] sm:$0xf] }
  0xb1   :  { %v6345_v57 = vshrl.u32 %v251_v56, 7  ;;  %v5190_v56 = vld [vmem:[%s7314_s6 + $0x40] ss:$16 sps:$4 sm:$0xff]  }
  0xb3   :  { %1362 = vmatpush1.bf16.msra.mxu0 %v5058_v60  ;;  %1526 = vmatpush1.bf16.msra.mxu1 %v5061_v61  ;;  %v6348_v58 = vsub.s32 0, %v6345_v57  ;;  %v6356_v60 = vsub.s32 1, %v6345_v57  ;;  %v6359_v61 = vsub.s32 3, %v6345_v57 }
  0xb4   :  { %1363 = vmatprep.subr.bf16.mxu0 %v5066_v62  ;;  %1527 = vmatprep.subr.bf16.mxu1 %v5069_v63 }
  0xb5   :  { %v254_v62 = vrot.slane %v6353_v59, %v6348_v58  ;;  %v258_v63 = vrot.slane %v6353_v59, %v6356_v60 }
  0xb7   :  { %1364 = vmatpush1.bf16.msra.mxu0 %v5064_v0  ;;  %1528 = vmatpush1.bf16.msra.mxu1 %v5067_v1  ;;  %v266_v0 = vrot.slane %v6353_v59, %v6359_v61 }
  0xb8   :  { %1365 = vmatprep.subr.bf16.mxu0 %v5072_v2  ;;  %1529 = vmatprep.subr.bf16.mxu1 %v5075_v3 }
  0xbb   :  { %1366 = vmatpush1.bf16.msra.mxu0 %v5070_v4  ;;  %1530 = vmatpush1.bf16.msra.mxu1 %v5073_v5 }
  0xbc   :  { %1367 = vmatprep.subr.bf16.mxu0 %v5078_v6  ;;  %1531 = vmatprep.subr.bf16.mxu1 %v5081_v7 }
  0xbf   :  { %1368 = vmatpush1.bf16.msra.mxu0 %v5076_v8  ;;  %1532 = vmatpush1.bf16.msra.mxu1 %v5079_v9 }
  0xc0   :  { %1378 = vmatprep.subr.bf16.mxu0 %v5084_v11  ;;  %1542 = vmatprep.subr.bf16.mxu1 %v5087_v12 }
  0xc2   :  { %1370 = vmatmul.mubr.bf16.vlgmr.msra.gmra.mrb[0].mxu0 %v50_v13  ;;  %1534 = vmatmul.mubr.bf16.vlgmr.msra.gmra.mrb[0].mxu1 %v50_v13 }
  0xc3   :  { %1379 = vmatpush1.bf16.msra.mxu0 %v5082_v14  ;;  %1543 = vmatpush1.bf16.msra.mxu1 %v5085_v15 }
  0xc4   :  { %1410 = vmatprep.mubr.bf16.mxu0 %v5554_v17  ;;  %1574 = vmatprep.mubr.bf16.mxu1 %v5554_v17 }
  0xc5   :  { %1987 = vmatprep.subr.bf16.mxu0 %v5090_v16  ;;  %2290 = vmatprep.subr.bf16.mxu1 %v5186_v53  ;;  %v5136_v16 = vld [vmem:[%s7313_s4 + $0x100] ss:$8 sps:$4 sm:$0xff]  }
  0xce   :  { %4375 = vmatmul.mubr.msk.bf16.vlgmr.msra.gmra.mrb[0].mxu0 %vm1251_vm0, %v52_v19  ;;  %4376 = vmatmul.mubr.msk.bf16.vlgmr.msra.gmra.mrb[0].mxu1 %vm1251_vm0, %v52_v19  ;;  %v5141_v19 = vld [vmem:[%s7313_s4 + $0x114] ss:$8 sps:$4 sm:$0xff]  }
  0xcf   :  { %1988 = vmatpush1.bf16.msra.mxu0 %v5088_v20  ;;  %2322 = vmatprep.mubr.bf16.mxu1 %v5554_v17 }
  0xd0   :  { %1989 = vmatprep.subr.bf16.mxu0 %v5093_v21  ;;  %2291 = vmatpush1.bf16.msra.mxu1 %v5184_v52  ;;  %v5139_v21 = vld [vmem:[%s7313_s4 + $0x110] ss:$8 sps:$4 sm:$0xff]  }
  0xd1   :  { %2292 = vmatprep.subr.bf16.mxu1 %v5189_v55  ;;  %v5181_v52 = vld [vmem:[%s7313_s4 + $0x1f0] ss:$8 sps:$4 sm:$0xff]   ;;  %v5192_v55 = vld [vmem:[%s7314_s6 + $0x44] ss:$16 sps:$4 sm:$0xff]  }
  0xd3   :  { %1990 = vmatpush1.bf16.msra.mxu0 %v5091_v22  ;;  %v5144_v22 = vld [vmem:[%s7313_s4 + $0x124] ss:$8 sps:$4 sm:$0xff]  }
  0xd4   :  { %1991 = vmatprep.subr.bf16.mxu0 %v5096_v23  ;;  %2293 = vmatpush1.bf16.msra.mxu1 %v5187_v54  ;;  %v5142_v23 = vld [vmem:[%s7313_s4 + $0x120] ss:$8 sps:$4 sm:$0xff]  }
  0xd5   :  { %2294 = vmatprep.subr.bf16.mxu1 %v5192_v55 }
  0xd7   :  { %1992 = vmatpush1.bf16.msra.mxu0 %v5094_v24  ;;  %v5147_v24 = vld [vmem:[%s7313_s4 + $0x134] ss:$8 sps:$4 sm:$0xff]  }
  0xd8   :  { %1993 = vmatprep.subr.bf16.mxu0 %v5099_v25  ;;  %v5145_v25 = vld [vmem:[%s7313_s4 + $0x130] ss:$8 sps:$4 sm:$0xff]   ;;  %2295 = vmatpush1.bf16.msra.mxu1 %v5190_v56 }
  0xd9   :  { %v5211_v56 = vld [vmem:[%s7314_s6 + $0x28] ss:$16 sps:$4 sm:$0xff]  }
  0xdb   :  { %1994 = vmatpush1.bf16.msra.mxu0 %v5097_v26  ;;  %v5150_v26 = vld [vmem:[%s7313_s4 + $0x144] ss:$8 sps:$4 sm:$0xff]  }
  0xdc   :  { %1995 = vmatprep.subr.bf16.mxu0 %v5102_v27  ;;  %v5148_v27 = vld [vmem:[%s7313_s4 + $0x140] ss:$8 sps:$4 sm:$0xff]  }
  0xdf   :  { %1996 = vmatpush1.bf16.msra.mxu0 %v5100_v28  ;;  %v5153_v28 = vld [vmem:[%s7313_s4 + $0x154] ss:$8 sps:$4 sm:$0xff]  }
  0xe0   :  { %1997 = vmatprep.subr.bf16.mxu0 %v5105_v29  ;;  %v5151_v29 = vld [vmem:[%s7313_s4 + $0x150] ss:$8 sps:$4 sm:$0xff]  }
  0xe3   :  { %1998 = vmatpush1.bf16.msra.mxu0 %v5103_v30  ;;  %v5156_v30 = vld [vmem:[%s7313_s4 + $0x164] ss:$8 sps:$4 sm:$0xff]  }
  0xe4   :  { %1999 = vmatprep.subr.bf16.mxu0 %v5108_v31  ;;  %v5154_v31 = vld [vmem:[%s7313_s4 + $0x160] ss:$8 sps:$4 sm:$0xff]  }
  0xe7   :  { %2000 = vmatpush1.bf16.msra.mxu0 %v5106_v32  ;;  %v5159_v32 = vld [vmem:[%s7313_s4 + $0x174] ss:$8 sps:$4 sm:$0xff]  }
  0xe8   :  { %2001 = vmatprep.subr.bf16.mxu0 %v5111_v33  ;;  %v5157_v33 = vld [vmem:[%s7313_s4 + $0x170] ss:$8 sps:$4 sm:$0xff]  }
  0xeb   :  { %2002 = vmatpush1.bf16.msra.mxu0 %v5109_v34  ;;  %v5162_v34 = vld [vmem:[%s7313_s4 + $0x184] ss:$8 sps:$4 sm:$0xff]  }
  0xec   :  { %2003 = vmatprep.subr.bf16.mxu0 %v5114_v35  ;;  %v5160_v35 = vld [vmem:[%s7313_s4 + $0x180] ss:$8 sps:$4 sm:$0xff]  }
  0xef   :  { %2004 = vmatpush1.bf16.msra.mxu0 %v5112_v36  ;;  %v5165_v36 = vld [vmem:[%s7313_s4 + $0x194] ss:$8 sps:$4 sm:$0xff]  }
  0xf0   :  { %2005 = vmatprep.subr.bf16.mxu0 %v5117_v37  ;;  %v5163_v37 = vld [vmem:[%s7313_s4 + $0x190] ss:$8 sps:$4 sm:$0xff]  }
  0xf3   :  { %2006 = vmatpush1.bf16.msra.mxu0 %v5115_v38  ;;  %v5168_v38 = vld [vmem:[%s7313_s4 + $0x1a4] ss:$8 sps:$4 sm:$0xff]  }
  0xf4   :  { %2007 = vmatprep.subr.bf16.mxu0 %v5120_v39  ;;  %v5166_v39 = vld [vmem:[%s7313_s4 + $0x1a0] ss:$8 sps:$4 sm:$0xff]  }
  0xf7   :  { %2008 = vmatpush1.bf16.msra.mxu0 %v5118_v40  ;;  %v5171_v40 = vld [vmem:[%s7313_s4 + $0x1b4] ss:$8 sps:$4 sm:$0xff]  }
  0xf8   :  { %2009 = vmatprep.subr.bf16.mxu0 %v5123_v41  ;;  %v5169_v41 = vld [vmem:[%s7313_s4 + $0x1b0] ss:$8 sps:$4 sm:$0xff]  }
  0xfb   :  { %2010 = vmatpush1.bf16.msra.mxu0 %v5121_v42  ;;  %v5174_v42 = vld [vmem:[%s7313_s4 + $0x1c4] ss:$8 sps:$4 sm:$0xff]  }
  0xfc   :  { %2011 = vmatprep.subr.bf16.mxu0 %v5126_v43  ;;  %v5172_v43 = vld [vmem:[%s7313_s4 + $0x1c0] ss:$8 sps:$4 sm:$0xff]  }
  0xff   :  { %2012 = vmatpush1.bf16.msra.mxu0 %v5124_v44  ;;  %v6445_v44 = vsub.s32 2, %v6345_v57 }
 0x100   :  { %2013 = vmatprep.subr.bf16.mxu0 %v5129_v45  ;;  %v5177_v45 = vld [vmem:[%s7313_s4 + $0x1d4] ss:$8 sps:$4 sm:$0xff]  }
 0x103   :  { %2014 = vmatpush1.bf16.msra.mxu0 %v5127_v46  ;;  %v5175_v46 = vld [vmem:[%s7313_s4 + $0x1d0] ss:$8 sps:$4 sm:$0xff]  }
 0x104   :  { %2015 = vmatprep.subr.bf16.mxu0 %v5132_v47  ;;  %v262_v47 = vrot.slane %v6353_v59, %v6445_v44  ;;  %v5195_v59 = vld [vmem:[%s7314_s6 + $0x64] ss:$16 sps:$4 sm:$0xff]  }
 0x105   :  { %2296 = vmatprep.subr.bf16.mxu1 %v5195_v59  ;;  %v5216_v59 = vld [vmem:[%s7314_s6 + $0x4c] ss:$16 sps:$4 sm:$0xff]  }
 0x107   :  { %2016 = vmatpush1.bf16.msra.mxu0 %v5130_v48  ;;  %v5180_v48 = vld [vmem:[%s7313_s4 + $0x1e4] ss:$8 sps:$4 sm:$0xff]  }
 0x108   :  { %2017 = vmatprep.subr.bf16.mxu0 %v5135_v49  ;;  %v5178_v49 = vld [vmem:[%s7313_s4 + $0x1e0] ss:$8 sps:$4 sm:$0xff]  }
 0x10b   :  { %2018 = vmatpush1.bf16.msra.mxu0 %v5133_v50 }
 0x10c   :  { %2028 = vmatprep.subr.bf16.mxu0 %v5138_v51  ;;  %v5183_v51 = vld [vmem:[%s7313_s4 + $0x1f4] ss:$8 sps:$4 sm:$0xff]  }
 0x1a1   :  { %v1412_v1 = vpop.f32.mrb[0].mxu0  ;;  %v6367_v2 = vpop.f32.mrb[0].mxu1 }
 0x1a2   :  { %v4741_v3 = vadd.f32 %v1412_v1, %v254_v62  ;;  %v1414_v4 = vpop.f32.mrb[1].mxu0  ;;  %v1578_v5 = vpop.f32.mrb[1].mxu1  ;;  %v4743_v50 = vadd.f32 %v6367_v2, %v262_v47  ;;  %v5193_v62 = vld [vmem:[%s7314_s6 + $0x60] ss:$16 sps:$4 sm:$0xff]   ;;  %v5201_v1 = vld [vmem:[%s7314_s6 + $0xa4] ss:$16 sps:$4 sm:$0xff]  }
 0x1a3   :  { %v4742_v6 = vadd.f32 %v1414_v4, %v258_v63  ;;  %v4744_v7 = vadd.f32 %v1578_v5, %v266_v0  ;;  %v1416_v8 = vpop.f32.mrb[2].mxu0  ;;  %v1580_v9 = vpop.f32.mrb[2].mxu1  ;;  %2297 = vmatpush1.bf16.msra.mxu1 %v5193_v62  ;;  %v5198_v63 = vld [vmem:[%s7314_s6 + $0x84] ss:$16 sps:$4 sm:$0xff]   ;;  %v5196_v0 = vld [vmem:[%s7314_s6 + $0x80] ss:$16 sps:$4 sm:$0xff]  }
 0x1a4   :  { %v1583_v10 = vmax.f32 %v4741_v3, 0.0  ;;  %v1417_v11 = vpop.f32.mrb[3].mxu0  ;;  %v1581_v12 = vpop.f32.mrb[3].mxu1  ;;  %v1585_v53 = vmax.f32 %v4743_v50, 0.0  ;;  %2298 = vmatprep.subr.bf16.mxu1 %v5198_v63  ;;  %v5199_v2 = vld [vmem:[%s7314_s6 + $0xa0] ss:$16 sps:$4 sm:$0xff]  }
 0x1a5   :  { %v1584_v13 = vmax.f32 %v4742_v6, 0.0  ;;  %v1586_v14 = vmax.f32 %v4744_v7, 0.0  ;;  %v5204_v3 = vld [vmem:[%s7314_s6 + $0xc4] ss:$16 sps:$4 sm:$0xff]   ;;  %v5202_v4 = vld [vmem:[%s7314_s6 + $0xc0] ss:$16 sps:$4 sm:$0xff]  }
 0x1a6   :  { %v1587_v18 = vpack.c.bf16 %v1583_v10, %v1583_v10  ;;  %v1589_v54 = vpack.c.bf16 %v1585_v53, %v1585_v53  ;;  %v5207_v5 = vld [vmem:[%s7314_s6 + $0xe4] ss:$16 sps:$4 sm:$0xff]   ;;  %v5205_v6 = vld [vmem:[%s7314_s6 + $0xe0] ss:$16 sps:$4 sm:$0xff]   ;;  %v5210_v7 = vld [vmem:[%s7314_s6 + $0xc] ss:$16 sps:$4 sm:$0xff]  }
 0x1a7   :  { %v1588_v15 = vpack.c.bf16 %v1584_v13, %v1584_v13  ;;  %v1590_v20 = vpack.c.bf16 %v1586_v14, %v1586_v14  ;;  %2299 = vmatpush1.bf16.msra.mxu1 %v5196_v0  ;;  %v5235_v8 = vld [vmem:[%s7316_s8 + $0x8] ss:$28 sps:$4 sm:$0xff]   ;;  %v5241_v10 = vld [vmem:[%s7316_s8 + $0x40] ss:$28 sps:$4 sm:$0xff]   ;;  %v5247_v13 = vld [vmem:[%s7316_s8 + $0x78] ss:$28 sps:$4 sm:$0xff]  }
 0x1a8   :  { %2300 = vmatprep.subr.bf16.mxu1 %v5201_v1  ;;  %v5237_v9 = vld [vmem:[%s7316_s8 + $0xc] ss:$28 sps:$4 sm:$0xff]   ;;  %v5243_v11 = vld [vmem:[%s7316_s8 + $0x44] ss:$28 sps:$4 sm:$0xff]   ;;  %v5249_v12 = vld [vmem:[%s7316_s8 + $0x7c] ss:$28 sps:$4 sm:$0xff]  }
 0x1a9   :  { %2019 = vmatprep.mubr.bf16.mxu0 %v1588_v15  ;;  %v5255_v14 = vld [vmem:[%s7316_s8 + $0xb4] ss:$28 sps:$4 sm:$0xff]   ;;  %v5214_v62 = vld [vmem:[%s7314_s6 + $0x48] ss:$16 sps:$4 sm:$0xff]   ;;  %v5219_v63 = vld [vmem:[%s7314_s6 + $0x6c] ss:$16 sps:$4 sm:$0xff]  }
 0x1aa   :  { %2020 = vmatmul.mubr.bf16.vlgmr.msra.gmra.mrb[4].mxu0 %v1587_v18  ;;  %v5253_v15 = vld [vmem:[%s7316_s8 + $0xb0] ss:$28 sps:$4 sm:$0xff]   ;;  %v5259_v18 = vld [vmem:[%s7316_s8 + $0xe8] ss:$28 sps:$4 sm:$0xff]  }
 0x1ab   :  { %2029 = vmatpush1.bf16.msra.mxu0 %v5136_v16  ;;  %2060 = vmatprep.mubr.bf16.mxu0 %v1590_v20  ;;  %v5261_v16 = vld [vmem:[%s7316_s8 + $0xec] ss:$28 sps:$4 sm:$0xff]   ;;  %v5265_v20 = vld [vmem:[%s7316_s8 + $0x120] ss:$28 sps:$4 sm:$0xff]  }
 0x1ac   :  { %2030 = vmatprep.subr.bf16.mxu0 %v5141_v19  ;;  %2301 = vmatpush1.bf16.msra.mxu1 %v5199_v2  ;;  %v5267_v19 = vld [vmem:[%s7316_s8 + $0x124] ss:$28 sps:$4 sm:$0xff]   ;;  %v5217_v0 = vld [vmem:[%s7314_s6 + $0x68] ss:$16 sps:$4 sm:$0xff]   ;;  %v5225_v2 = vld [vmem:[%s7314_s6 + $0xac] ss:$16 sps:$4 sm:$0xff]  }
 0x1ad   :  { %2302 = vmatprep.subr.bf16.mxu1 %v5204_v3  ;;  %v5220_v1 = vld [vmem:[%s7314_s6 + $0x88] ss:$16 sps:$4 sm:$0xff]  }
 0x1ae   :  { %v5223_v3 = vld [vmem:[%s7314_s6 + $0xa8] ss:$16 sps:$4 sm:$0xff]  }
 0x1af   :  { %2031 = vmatpush1.bf16.msra.mxu0 %v5139_v21  ;;  %v5273_v21 = vld [vmem:[%s7316_s8 + $0x15c] ss:$28 sps:$4 sm:$0xff]  }
 0x1b0   :  { %2032 = vmatprep.subr.bf16.mxu0 %v5144_v22  ;;  %2303 = vmatpush1.bf16.msra.mxu1 %v5202_v4  ;;  %v5271_v22 = vld [vmem:[%s7316_s8 + $0x158] ss:$28 sps:$4 sm:$0xff]   ;;  %v5228_v4 = vld [vmem:[%s7314_s6 + $0xcc] ss:$16 sps:$4 sm:$0xff]  }
 0x1b1   :  { %2304 = vmatprep.subr.bf16.mxu1 %v5207_v5  ;;  %v5226_v5 = vld [vmem:[%s7314_s6 + $0xc8] ss:$16 sps:$4 sm:$0xff]  }
 0x1b3   :  { %2033 = vmatpush1.bf16.msra.mxu0 %v5142_v23  ;;  %v5279_v23 = vld [vmem:[%s7316_s8 + $0x194] ss:$28 sps:$4 sm:$0xff]  }
 0x1b4   :  { %2034 = vmatprep.subr.bf16.mxu0 %v5147_v24  ;;  %2305 = vmatpush1.bf16.msra.mxu1 %v5205_v6  ;;  %v5277_v24 = vld [vmem:[%s7316_s8 + $0x190] ss:$28 sps:$4 sm:$0xff]  }
 0x1b5   :  { %2331 = vmatprep.subr.bf16.mxu1 %v5210_v7  ;;  %v5231_v6 = vld [vmem:[%s7314_s6 + $0xec] ss:$16 sps:$4 sm:$0xff]   ;;  %v5229_v7 = vld [vmem:[%s7314_s6 + $0xe8] ss:$16 sps:$4 sm:$0xff]  }
 0x1b7   :  { %2035 = vmatpush1.bf16.msra.mxu0 %v5145_v25  ;;  %v5285_v25 = vld [vmem:[%s7316_s8 + $0x1cc] ss:$28 sps:$4 sm:$0xff]  }
 0x1b8   :  { %2036 = vmatprep.subr.bf16.mxu0 %v5150_v26  ;;  %v5283_v26 = vld [vmem:[%s7316_s8 + $0x1c8] ss:$28 sps:$4 sm:$0xff]  }
 0x1bb   :  { %2037 = vmatpush1.bf16.msra.mxu0 %v5148_v27  ;;  %v5291_v27 = vld [vmem:[%s7316_s8 + $0x204] ss:$28 sps:$4 sm:$0xff]  }
 0x1bc   :  { %2038 = vmatprep.subr.bf16.mxu0 %v5153_v28  ;;  %v5289_v28 = vld [vmem:[%s7316_s8 + $0x200] ss:$28 sps:$4 sm:$0xff]  }
 0x1bf   :  { %2039 = vmatpush1.bf16.msra.mxu0 %v5151_v29  ;;  %v5297_v29 = vld [vmem:[%s7316_s8 + $0x23c] ss:$28 sps:$4 sm:$0xff]  }
 0x1c0   :  { %2040 = vmatprep.subr.bf16.mxu0 %v5156_v30  ;;  %v5295_v30 = vld [vmem:[%s7316_s8 + $0x238] ss:$28 sps:$4 sm:$0xff]  }
 0x1c3   :  { %2041 = vmatpush1.bf16.msra.mxu0 %v5154_v31  ;;  %v5303_v31 = vld [vmem:[%s7316_s8 + $0x274] ss:$28 sps:$4 sm:$0xff]  }
 0x1c4   :  { %2042 = vmatprep.subr.bf16.mxu0 %v5159_v32  ;;  %v5301_v32 = vld [vmem:[%s7316_s8 + $0x270] ss:$28 sps:$4 sm:$0xff]  }
 0x1c7   :  { %2043 = vmatpush1.bf16.msra.mxu0 %v5157_v33  ;;  %v5309_v33 = vld [vmem:[%s7316_s8 + $0x2ac] ss:$28 sps:$4 sm:$0xff]  }
 0x1c8   :  { %2044 = vmatprep.subr.bf16.mxu0 %v5162_v34  ;;  %v5307_v34 = vld [vmem:[%s7316_s8 + $0x2a8] ss:$28 sps:$4 sm:$0xff]  }
 0x1cb   :  { %2045 = vmatpush1.bf16.msra.mxu0 %v5160_v35  ;;  %v5315_v35 = vld [vmem:[%s7316_s8 + $0x2e4] ss:$28 sps:$4 sm:$0xff]  }
 0x1cc   :  { %2046 = vmatprep.subr.bf16.mxu0 %v5165_v36  ;;  %v5313_v36 = vld [vmem:[%s7316_s8 + $0x2e0] ss:$28 sps:$4 sm:$0xff]  }
 0x1cf   :  { %2047 = vmatpush1.bf16.msra.mxu0 %v5163_v37  ;;  %v1655_v37 = vld [vmem:[%s7317_s5] sm:$0x3] }
 0x1d0   :  { %2048 = vmatprep.subr.bf16.mxu0 %v5168_v38  ;;  %v1660_v38 = vrot.slane %v1655_v37, %v6348_v58 }
 0x1d3   :  { %2049 = vmatpush1.bf16.msra.mxu0 %v5166_v39  ;;  %v1664_v39 = vrot.slane %v1655_v37, %v6356_v60  ;;  %v5318_v37 = vld [vmem:[%s7316_s8 + $0x314] ss:$28 sps:$4 sm:$0xff]  }
 0x1d4   :  { %2050 = vmatprep.subr.bf16.mxu0 %v5171_v40 }
 0x1d7   :  { %2051 = vmatpush1.bf16.msra.mxu0 %v5169_v41 }
 0x1d8   :  { %2052 = vmatprep.subr.bf16.mxu0 %v5174_v42 }
 0x1db   :  { %2053 = vmatpush1.bf16.msra.mxu0 %v5172_v43 }
 0x1dc   :  { %2054 = vmatprep.subr.bf16.mxu0 %v5177_v45 }
 0x1df   :  { %2055 = vmatpush1.bf16.msra.mxu0 %v5175_v46 }
 0x1e0   :  { %2056 = vmatprep.subr.bf16.mxu0 %v5180_v48 }
 0x1e3   :  { %2057 = vmatpush1.bf16.msra.mxu0 %v5178_v49  ;;  %v2069_v49 = vld [vmem:[%s7320_s1] sm:$0xff] }
 0x1e4   :  { %2058 = vmatprep.subr.bf16.mxu0 %v5183_v51 }
 0x1e7   :  { %2059 = vmatpush1.bf16.msra.mxu0 %v5181_v52  ;;  %v5208_v52 = vld [vmem:[%s7314_s6 + $0x8] ss:$16 sps:$4 sm:$0xff]  }
 0x1e8   :  { %3907 = vmatprep.subr.bf16.mxu0 %v5237_v9  ;;  %v5232_v9 = vld [vmem:[%s7316_s8] ss:$28 sps:$4 sm:$0xff]  }
 0x1ea   :  { %2061 = vmatmul.mubr.bf16.vlgmr.msra.gmra.mrb[4].mxu0 %v1589_v54  ;;  %v5213_v54 = vld [vmem:[%s7314_s6 + $0x2c] ss:$16 sps:$4 sm:$0xff]  }
 0x1eb   :  { %3908 = vmatpush1.bf16.msra.mxu0 %v5235_v8  ;;  %v5234_v8 = vld [vmem:[%s7316_s8 + $0x4] ss:$28 sps:$4 sm:$0xff]  }
 0x1ec   :  { %3909 = vmatprep.subr.bf16.mxu0 %v5243_v11  ;;  %v5238_v11 = vld [vmem:[%s7316_s8 + $0x38] ss:$28 sps:$4 sm:$0xff]  }
 0x1ef   :  { %3910 = vmatpush1.bf16.msra.mxu0 %v5241_v10  ;;  %v5240_v10 = vld [vmem:[%s7316_s8 + $0x3c] ss:$28 sps:$4 sm:$0xff]  }
 0x1f0   :  { %3911 = vmatprep.subr.bf16.mxu0 %v5249_v12  ;;  %v5246_v12 = vld [vmem:[%s7316_s8 + $0x74] ss:$28 sps:$4 sm:$0xff]  }
 0x1f3   :  { %3912 = vmatpush1.bf16.msra.mxu0 %v5247_v13  ;;  %v5244_v13 = vld [vmem:[%s7316_s8 + $0x70] ss:$28 sps:$4 sm:$0xff]  }
 0x1f4   :  { %3913 = vmatprep.subr.bf16.mxu0 %v5255_v14  ;;  %v5252_v14 = vld [vmem:[%s7316_s8 + $0xac] ss:$28 sps:$4 sm:$0xff]  }
 0x1f7   :  { %3914 = vmatpush1.bf16.msra.mxu0 %v5253_v15  ;;  %v5250_v15 = vld [vmem:[%s7316_s8 + $0xa8] ss:$28 sps:$4 sm:$0xff]  }
 0x1f8   :  { %3915 = vmatprep.subr.bf16.mxu0 %v5261_v16  ;;  %v5258_v16 = vld [vmem:[%s7316_s8 + $0xe4] ss:$28 sps:$4 sm:$0xff]  }
 0x1fb   :  { %3916 = vmatpush1.bf16.msra.mxu0 %v5259_v18  ;;  %v5256_v18 = vld [vmem:[%s7316_s8 + $0xe0] ss:$28 sps:$4 sm:$0xff]  }
 0x1fc   :  { %3917 = vmatprep.subr.bf16.mxu0 %v5267_v19  ;;  %v5264_v19 = vld [vmem:[%s7316_s8 + $0x11c] ss:$28 sps:$4 sm:$0xff]  }
 0x1ff   :  { %3918 = vmatpush1.bf16.msra.mxu0 %v5265_v20  ;;  %v5262_v20 = vld [vmem:[%s7316_s8 + $0x118] ss:$28 sps:$4 sm:$0xff]  }
 0x200   :  { %3919 = vmatprep.subr.bf16.mxu0 %v5273_v21  ;;  %v5270_v21 = vld [vmem:[%s7316_s8 + $0x154] ss:$28 sps:$4 sm:$0xff]  }
 0x203   :  { %3920 = vmatpush1.bf16.msra.mxu0 %v5271_v22  ;;  %v5268_v22 = vld [vmem:[%s7316_s8 + $0x150] ss:$28 sps:$4 sm:$0xff]  }
 0x204   :  { %3921 = vmatprep.subr.bf16.mxu0 %v5279_v23  ;;  %v5276_v23 = vld [vmem:[%s7316_s8 + $0x18c] ss:$28 sps:$4 sm:$0xff]  }
 0x207   :  { %3922 = vmatpush1.bf16.msra.mxu0 %v5277_v24  ;;  %v5274_v24 = vld [vmem:[%s7316_s8 + $0x188] ss:$28 sps:$4 sm:$0xff]  }
 0x208   :  { %3923 = vmatprep.subr.bf16.mxu0 %v5285_v25  ;;  %v5282_v25 = vld [vmem:[%s7316_s8 + $0x1c4] ss:$28 sps:$4 sm:$0xff]  }
 0x20b   :  { %3924 = vmatpush1.bf16.msra.mxu0 %v5283_v26  ;;  %v5280_v26 = vld [vmem:[%s7316_s8 + $0x1c0] ss:$28 sps:$4 sm:$0xff]  }
 0x20c   :  { %3925 = vmatprep.subr.bf16.mxu0 %v5291_v27  ;;  %v5288_v27 = vld [vmem:[%s7316_s8 + $0x1fc] ss:$28 sps:$4 sm:$0xff]  }
 0x20f   :  { %3926 = vmatpush1.bf16.msra.mxu0 %v5289_v28  ;;  %v5286_v28 = vld [vmem:[%s7316_s8 + $0x1f8] ss:$28 sps:$4 sm:$0xff]  }
 0x210   :  { %3927 = vmatprep.subr.bf16.mxu0 %v5297_v29  ;;  %v5294_v29 = vld [vmem:[%s7316_s8 + $0x234] ss:$28 sps:$4 sm:$0xff]  }
 0x213   :  { %3928 = vmatpush1.bf16.msra.mxu0 %v5295_v30  ;;  %v5292_v30 = vld [vmem:[%s7316_s8 + $0x230] ss:$28 sps:$4 sm:$0xff]  }
 0x214   :  { %3929 = vmatprep.subr.bf16.mxu0 %v5303_v31  ;;  %v5300_v31 = vld [vmem:[%s7316_s8 + $0x26c] ss:$28 sps:$4 sm:$0xff]  }
 0x217   :  { %3930 = vmatpush1.bf16.msra.mxu0 %v5301_v32  ;;  %v5298_v32 = vld [vmem:[%s7316_s8 + $0x268] ss:$28 sps:$4 sm:$0xff]  }
 0x218   :  { %3931 = vmatprep.subr.bf16.mxu0 %v5309_v33  ;;  %v5306_v33 = vld [vmem:[%s7316_s8 + $0x2a4] ss:$28 sps:$4 sm:$0xff]  }
 0x21b   :  { %3932 = vmatpush1.bf16.msra.mxu0 %v5307_v34  ;;  %v5304_v34 = vld [vmem:[%s7316_s8 + $0x2a0] ss:$28 sps:$4 sm:$0xff]  }
 0x21c   :  { %3933 = vmatprep.subr.bf16.mxu0 %v5315_v35  ;;  %v5312_v35 = vld [vmem:[%s7316_s8 + $0x2dc] ss:$28 sps:$4 sm:$0xff]  }
 0x21f   :  { %3934 = vmatpush1.bf16.msra.mxu0 %v5313_v36  ;;  %v5310_v36 = vld [vmem:[%s7316_s8 + $0x2d8] ss:$28 sps:$4 sm:$0xff]  }
 0x2bd   :  { %v2062_v40 = vpop.f32.mrb[4].mxu0 }
 0x2be   :  { %v4745_v41 = vadd.f32 %v2062_v40, %v1660_v38  ;;  %v2064_v42 = vpop.f32.mrb[5].mxu0  ;;  %v5321_v38 = vld [vmem:[%s7316_s8 + $0x31c] ss:$28 sps:$4 sm:$0xff]   ;;  %v5316_v40 = vld [vmem:[%s7316_s8 + $0x310] ss:$28 sps:$4 sm:$0xff]  }
 0x2bf   :  { %v4746_v43 = vadd.f32 %v2064_v42, %v1664_v39  ;;  %v2066_v45 = vpop.f32.mrb[6].mxu0  ;;  %v5319_v39 = vld [vmem:[%s7316_s8 + $0x318] ss:$28 sps:$4 sm:$0xff]   ;;  %3935 = vmatprep.subr.bf16.mxu0 %v5321_v38  ;;  %v5381_v38 = vld [vmem:[%s7316_s8 + $0x54c] ss:$28 sps:$4 sm:$0xff]  }
 0x2c0   :  { %4165 = vst [vmem:[%s7318_s11] sm:$0xff] %v4745_v41  ;;  %v2067_v46 = vpop.f32.mrb[7].mxu0  ;;  %3936 = vmatpush1.bf16.msra.mxu0 %v5319_v39  ;;  %v5327_v42 = vld [vmem:[%s7316_s8 + $0x354] ss:$28 sps:$4 sm:$0xff]   ;;  %v5322_v45 = vld [vmem:[%s7316_s8 + $0x348] ss:$28 sps:$4 sm:$0xff]  }
 0x2c1   :  { %v2070_v47 = vmul.f32 0.5, %v4746_v43  ;;  %4166 = vst [vmem:[%s7319_s12] sm:$0xff] %v4746_v43  ;;  %v5325_v43 = vld [vmem:[%s7316_s8 + $0x350] ss:$28 sps:$4 sm:$0xff]   ;;  %3937 = vmatprep.subr.bf16.mxu0 %v5327_v42  ;;  %v5330_v46 = vld [vmem:[%s7316_s8 + $0x384] ss:$28 sps:$4 sm:$0xff]  }
 0x2c2   :  { %v5379_v42 = vld [vmem:[%s7316_s8 + $0x548] ss:$28 sps:$4 sm:$0xff]  }
 0x2c3   :  { %v2071_v48 = vmul.f32 1.442695, %v2070_v47  ;;  %v5333_v47 = vld [vmem:[%s7316_s8 + $0x38c] ss:$28 sps:$4 sm:$0xff]  }
 0x2c4   :  { %3938 = vmatpush1.bf16.msra.mxu0 %v5325_v43  ;;  %v5384_v43 = vld [vmem:[%s7316_s8 + $0x57c] ss:$28 sps:$4 sm:$0xff]  }
 0x2c5   :  { %5552 = vpow2.f32 %v2071_v48  ;;  %3948 = vmatprep.subr.bf16.mxu0 %v5333_v47  ;;  %v6768_v48 = vld [vmem:[%s7321_s7] sm:$0xf] }
 0x2c6   :  { %v5385_v47 = vld [vmem:[%s7316_s8 + $0x580] ss:$28 sps:$4 sm:$0xff]  }
 0x2cf   :  { %v5553_v50 = vpop.eup %5552 }
 0x2d0   :  { %v2073_v51 = vmul.f32 %v5553_v50, %v2069_v49  ;;  %v2113_v49 = vrot.slane %v6768_v48, %v6348_v58  ;;  %v2117_v50 = vrot.slane %v6768_v48, %v6356_v60 }
 0x2d2   :  { %v2074_v53 = vadd.f32 %v4745_v41, %v2073_v51  ;;  %v5324_v41 = vld [vmem:[%s7316_s8 + $0x34c] ss:$28 sps:$4 sm:$0xff]  }
 0x2d4   :  { %v2075_v55 = vpack.c.bf16 %v2074_v53, %v2074_v53 }
 0x2d6   :  { %2323 = vmatmul.mubr.bf16.vlgmr.msra.gmra.mrb[4].mxu1 %v2075_v55 }
 0x2d7   :  { %2332 = vmatpush1.bf16.msra.mxu1 %v5208_v52  ;;  %2363 = vmatprep.mubr.bf16.mxu1 %v5554_v17  ;;  %v5222_v17 = vld [vmem:[%s7314_s6 + $0x8c] ss:$16 sps:$4 sm:$0xff]  }
 0x2d8   :  { %2333 = vmatprep.subr.bf16.mxu1 %v5213_v54 }
 0x2db   :  { %2334 = vmatpush1.bf16.msra.mxu1 %v5211_v56 }
 0x2dc   :  { %2335 = vmatprep.subr.bf16.mxu1 %v5216_v59 }
 0x2df   :  { %2336 = vmatpush1.bf16.msra.mxu1 %v5214_v62 }
 0x2e0   :  { %2337 = vmatprep.subr.bf16.mxu1 %v5219_v63 }
 0x2e3   :  { %2338 = vmatpush1.bf16.msra.mxu1 %v5217_v0  ;;  %v5328_v0 = vld [vmem:[%s7316_s8 + $0x380] ss:$28 sps:$4 sm:$0xff]  }
 0x2e4   :  { %2339 = vmatprep.subr.bf16.mxu1 %v5222_v17  ;;  %v5331_v17 = vld [vmem:[%s7316_s8 + $0x388] ss:$28 sps:$4 sm:$0xff]  }
 0x2e7   :  { %2340 = vmatpush1.bf16.msra.mxu1 %v5220_v1 }
 0x2e8   :  { %2341 = vmatprep.subr.bf16.mxu1 %v5225_v2  ;;  %v5336_v2 = vld [vmem:[%s7316_s8 + $0x3bc] ss:$28 sps:$4 sm:$0xff]  }
 0x2eb   :  { %2342 = vmatpush1.bf16.msra.mxu1 %v5223_v3  ;;  %v5339_v3 = vld [vmem:[%s7316_s8 + $0x3c4] ss:$28 sps:$4 sm:$0xff]  }
 0x2ec   :  { %2343 = vmatprep.subr.bf16.mxu1 %v5228_v4  ;;  %v5334_v4 = vld [vmem:[%s7316_s8 + $0x3b8] ss:$28 sps:$4 sm:$0xff]  }
 0x2ef   :  { %2344 = vmatpush1.bf16.msra.mxu1 %v5226_v5  ;;  %v5337_v5 = vld [vmem:[%s7316_s8 + $0x3c0] ss:$28 sps:$4 sm:$0xff]  }
 0x2f0   :  { %2345 = vmatprep.subr.bf16.mxu1 %v5231_v6  ;;  %v5342_v6 = vld [vmem:[%s7316_s8 + $0x3f4] ss:$28 sps:$4 sm:$0xff]  }
 0x2f3   :  { %2346 = vmatpush1.bf16.msra.mxu1 %v5229_v7  ;;  %v5345_v7 = vld [vmem:[%s7316_s8 + $0x3fc] ss:$28 sps:$4 sm:$0xff]  }
 0x2f4   :  { %3825 = vmatprep.subr.bf16.mxu1 %v5234_v8  ;;  %v5340_v8 = vld [vmem:[%s7316_s8 + $0x3f0] ss:$28 sps:$4 sm:$0xff]  }
 0x2f6   :  { %2364 = vmatmul.mubr.bf16.vlgmr.msra.gmra.mrb[8].mxu1 %v2075_v55 }
 0x2f7   :  { %3826 = vmatpush1.bf16.msra.mxu1 %v5232_v9  ;;  %v5343_v9 = vld [vmem:[%s7316_s8 + $0x3f8] ss:$28 sps:$4 sm:$0xff]  }
 0x2f8   :  { %3827 = vmatprep.subr.bf16.mxu1 %v5240_v10  ;;  %v5348_v10 = vld [vmem:[%s7316_s8 + $0x42c] ss:$28 sps:$4 sm:$0xff]  }
 0x2fb   :  { %3828 = vmatpush1.bf16.msra.mxu1 %v5238_v11  ;;  %v5351_v11 = vld [vmem:[%s7316_s8 + $0x434] ss:$28 sps:$4 sm:$0xff]  }
 0x2fc   :  { %3829 = vmatprep.subr.bf16.mxu1 %v5246_v12  ;;  %v5346_v12 = vld [vmem:[%s7316_s8 + $0x428] ss:$28 sps:$4 sm:$0xff]  }
 0x2ff   :  { %3830 = vmatpush1.bf16.msra.mxu1 %v5244_v13  ;;  %v5349_v13 = vld [vmem:[%s7316_s8 + $0x430] ss:$28 sps:$4 sm:$0xff]  }
 0x300   :  { %3831 = vmatprep.subr.bf16.mxu1 %v5252_v14  ;;  %v5354_v14 = vld [vmem:[%s7316_s8 + $0x464] ss:$28 sps:$4 sm:$0xff]  }
 0x303   :  { %3832 = vmatpush1.bf16.msra.mxu1 %v5250_v15  ;;  %v5357_v15 = vld [vmem:[%s7316_s8 + $0x46c] ss:$28 sps:$4 sm:$0xff]  }
 0x304   :  { %3833 = vmatprep.subr.bf16.mxu1 %v5258_v16  ;;  %v5352_v16 = vld [vmem:[%s7316_s8 + $0x460] ss:$28 sps:$4 sm:$0xff]  }
 0x307   :  { %3834 = vmatpush1.bf16.msra.mxu1 %v5256_v18  ;;  %v5355_v18 = vld [vmem:[%s7316_s8 + $0x468] ss:$28 sps:$4 sm:$0xff]  }
 0x308   :  { %3835 = vmatprep.subr.bf16.mxu1 %v5264_v19  ;;  %v5360_v19 = vld [vmem:[%s7316_s8 + $0x49c] ss:$28 sps:$4 sm:$0xff]  }
 0x30b   :  { %3836 = vmatpush1.bf16.msra.mxu1 %v5262_v20  ;;  %v5363_v20 = vld [vmem:[%s7316_s8 + $0x4a4] ss:$28 sps:$4 sm:$0xff]  }
 0x30c   :  { %3837 = vmatprep.subr.bf16.mxu1 %v5270_v21  ;;  %v5358_v21 = vld [vmem:[%s7316_s8 + $0x498] ss:$28 sps:$4 sm:$0xff]  }
 0x30f   :  { %3838 = vmatpush1.bf16.msra.mxu1 %v5268_v22  ;;  %v5361_v22 = vld [vmem:[%s7316_s8 + $0x4a0] ss:$28 sps:$4 sm:$0xff]  }
 0x310   :  { %3839 = vmatprep.subr.bf16.mxu1 %v5276_v23  ;;  %v5366_v23 = vld [vmem:[%s7316_s8 + $0x4d4] ss:$28 sps:$4 sm:$0xff]  }
 0x313   :  { %3840 = vmatpush1.bf16.msra.mxu1 %v5274_v24  ;;  %v5369_v24 = vld [vmem:[%s7316_s8 + $0x4dc] ss:$28 sps:$4 sm:$0xff]  }
 0x314   :  { %3841 = vmatprep.subr.bf16.mxu1 %v5282_v25  ;;  %v2125_v25 = vrot.slane %v6768_v48, %v6359_v61 }
 0x317   :  { %3842 = vmatpush1.bf16.msra.mxu1 %v5280_v26  ;;  %v5364_v26 = vld [vmem:[%s7316_s8 + $0x4d0] ss:$28 sps:$4 sm:$0xff]  }
 0x318   :  { %3843 = vmatprep.subr.bf16.mxu1 %v5288_v27  ;;  %v5367_v27 = vld [vmem:[%s7316_s8 + $0x4d8] ss:$28 sps:$4 sm:$0xff]  }
 0x31b   :  { %3844 = vmatpush1.bf16.msra.mxu1 %v5286_v28  ;;  %v5372_v28 = vld [vmem:[%s7316_s8 + $0x50c] ss:$28 sps:$4 sm:$0xff]  }
 0x31c   :  { %3845 = vmatprep.subr.bf16.mxu1 %v5294_v29  ;;  %v5375_v29 = vld [vmem:[%s7316_s8 + $0x514] ss:$28 sps:$4 sm:$0xff]  }
 0x31f   :  { %3846 = vmatpush1.bf16.msra.mxu1 %v5292_v30 }
 0x320   :  { %3847 = vmatprep.subr.bf16.mxu1 %v5300_v31 }
 0x323   :  { %3848 = vmatpush1.bf16.msra.mxu1 %v5298_v32 }
 0x324   :  { %3849 = vmatprep.subr.bf16.mxu1 %v5306_v33 }
 0x327   :  { %3850 = vmatpush1.bf16.msra.mxu1 %v5304_v34  ;;  %v5370_v34 = vld [vmem:[%s7316_s8 + $0x508] ss:$28 sps:$4 sm:$0xff]  }
 0x328   :  { %3851 = vmatprep.subr.bf16.mxu1 %v5312_v35  ;;  %v5373_v35 = vld [vmem:[%s7316_s8 + $0x510] ss:$28 sps:$4 sm:$0xff]  }
 0x32b   :  { %3852 = vmatpush1.bf16.msra.mxu1 %v5310_v36 }
 0x32c   :  { %3853 = vmatprep.subr.bf16.mxu1 %v5318_v37  ;;  %v5378_v37 = vld [vmem:[%s7316_s8 + $0x544] ss:$28 sps:$4 sm:$0xff]  }
 0x32f   :  { %3854 = vmatpush1.bf16.msra.mxu1 %v5316_v40 }
 0x330   :  { %3855 = vmatprep.subr.bf16.mxu1 %v5324_v41  ;;  %v5376_v41 = vld [vmem:[%s7316_s8 + $0x540] ss:$28 sps:$4 sm:$0xff]  }
 0x333   :  { %3856 = vmatpush1.bf16.msra.mxu1 %v5322_v45  ;;  %v5387_v45 = vld [vmem:[%s7316_s8 + $0x584] ss:$28 sps:$4 sm:$0xff]  }
 0x334   :  { %3866 = vmatprep.subr.bf16.mxu1 %v5330_v46  ;;  %v5382_v46 = vld [vmem:[%s7316_s8 + $0x578] ss:$28 sps:$4 sm:$0xff]  }
 0x3a9   :  { %v2324_v51 = vpop.f32.mrb[4].mxu1 }
 0x3aa   :  { %v2325_v52 = vadd.f32 %v2324_v51, %v2113_v49  ;;  %v2326_v53 = vpop.f32.mrb[5].mxu1  ;;  %v5390_v49 = vld [vmem:[%s7316_s8 + $0x5b4] ss:$28 sps:$4 sm:$0xff]  }
 0x3ab   :  { %v2327_v54 = vadd.f32 %v2326_v53, %v2117_v50  ;;  %v2328_v55 = vpop.f32.mrb[6].mxu1  ;;  %v5393_v50 = vld [vmem:[%s7316_s8 + $0x5bc] ss:$28 sps:$4 sm:$0xff]   ;;  %v5388_v51 = vld [vmem:[%s7316_s8 + $0x5b0] ss:$28 sps:$4 sm:$0xff]  }
 0x3ac   :  { %v2372_v56 = vmax.f32 %v2325_v52, 0.0  ;;  %v2329_v59 = vpop.f32.mrb[7].mxu1  ;;  %v5391_v52 = vld [vmem:[%s7316_s8 + $0x5b8] ss:$28 sps:$4 sm:$0xff]   ;;  %v5396_v53 = vld [vmem:[%s7316_s8 + $0x5ec] ss:$28 sps:$4 sm:$0xff]  }
 0x3ad   :  { %v2373_v62 = vmax.f32 %v2327_v54, 0.0  ;;  %v5399_v54 = vld [vmem:[%s7316_s8 + $0x5f4] ss:$28 sps:$4 sm:$0xff]   ;;  %v5394_v55 = vld [vmem:[%s7316_s8 + $0x5e8] ss:$28 sps:$4 sm:$0xff]  }
 0x3ae   :  { %v6782_v1 = vpack.c.bf16 %v2372_v56, %v2372_v56  ;;  %v5397_v56 = vld [vmem:[%s7316_s8 + $0x5f0] ss:$28 sps:$4 sm:$0xff]   ;;  %v5402_v59 = vld [vmem:[%s7316_s8 + $0x624] ss:$28 sps:$4 sm:$0xff]  }
 0x3af   :  { %v6774_v63 = vpack.c.bf16 %v2373_v62, %v2373_v62  ;;  %v5405_v62 = vld [vmem:[%s7316_s8 + $0x62c] ss:$28 sps:$4 sm:$0xff]  }
 0x3b1   :  { %3857 = vmatprep.mubr.bf16.mxu1 %v6774_v63  ;;  %3939 = vmatprep.mubr.bf16.mxu0 %v6774_v63 }
 0x3b2   :  { %3858 = vmatmul.mubr.bf16.vlgmr.msra.gmra.mrb[12].mxu1 %v6782_v1  ;;  %3940 = vmatmul.mubr.bf16.vlgmr.msra.gmra.mrb[8].mxu0 %v6782_v1 }
 0x3b3   :  { %3867 = vmatpush1.bf16.msra.mxu1 %v5328_v0  ;;  %3949 = vmatpush1.bf16.msra.mxu0 %v5331_v17  ;;  %v5400_v0 = vld [vmem:[%s7316_s8 + $0x620] ss:$28 sps:$4 sm:$0xff]   ;;  %v5403_v17 = vld [vmem:[%s7316_s8 + $0x628] ss:$28 sps:$4 sm:$0xff]  }
 0x3b4   :  { %3868 = vmatprep.subr.bf16.mxu1 %v5336_v2  ;;  %3950 = vmatprep.subr.bf16.mxu0 %v5339_v3  ;;  %v5408_v2 = vld [vmem:[%s7316_s8 + $0x65c] ss:$28 sps:$4 sm:$0xff]   ;;  %v5411_v3 = vld [vmem:[%s7316_s8 + $0x664] ss:$28 sps:$4 sm:$0xff]  }
 0x3b7   :  { %3869 = vmatpush1.bf16.msra.mxu1 %v5334_v4  ;;  %3951 = vmatpush1.bf16.msra.mxu0 %v5337_v5  ;;  %v5406_v4 = vld [vmem:[%s7316_s8 + $0x658] ss:$28 sps:$4 sm:$0xff]   ;;  %v5409_v5 = vld [vmem:[%s7316_s8 + $0x660] ss:$28 sps:$4 sm:$0xff]  }
 0x3b8   :  { %3870 = vmatprep.subr.bf16.mxu1 %v5342_v6  ;;  %3952 = vmatprep.subr.bf16.mxu0 %v5345_v7  ;;  %v2121_v6 = vrot.slane %v6768_v48, %v6445_v44  ;;  %v5414_v7 = vld [vmem:[%s7316_s8 + $0x694] ss:$28 sps:$4 sm:$0xff]  }
 0x3b9   :  { %v5415_v48 = vld [vmem:[%s7316_s8 + $0x698] ss:$28 sps:$4 sm:$0xff]  }
 0x3bb   :  { %3871 = vmatpush1.bf16.msra.mxu1 %v5340_v8  ;;  %3953 = vmatpush1.bf16.msra.mxu0 %v5343_v9  ;;  %v5417_v8 = vld [vmem:[%s7316_s8 + $0x69c] ss:$28 sps:$4 sm:$0xff]   ;;  %v5412_v9 = vld [vmem:[%s7316_s8 + $0x690] ss:$28 sps:$4 sm:$0xff]  }
 0x3bc   :  { %3872 = vmatprep.subr.bf16.mxu1 %v5348_v10  ;;  %3954 = vmatprep.subr.bf16.mxu0 %v5351_v11  ;;  %v5420_v11 = vld [vmem:[%s7316_s8 + $0x6cc] ss:$28 sps:$4 sm:$0xff]  }
 0x3bf   :  { %3873 = vmatpush1.bf16.msra.mxu1 %v5346_v12  ;;  %3955 = vmatpush1.bf16.msra.mxu0 %v5349_v13  ;;  %v5423_v12 = vld [vmem:[%s7316_s8 + $0x6d4] ss:$28 sps:$4 sm:$0xff]   ;;  %v5418_v13 = vld [vmem:[%s7316_s8 + $0x6c8] ss:$28 sps:$4 sm:$0xff]  }
 0x3c0   :  { %3874 = vmatprep.subr.bf16.mxu1 %v5354_v14  ;;  %3956 = vmatprep.subr.bf16.mxu0 %v5357_v15  ;;  %v5421_v14 = vld [vmem:[%s7316_s8 + $0x6d0] ss:$28 sps:$4 sm:$0xff]  }
 0x3c3   :  { %3875 = vmatpush1.bf16.msra.mxu1 %v5352_v16  ;;  %3957 = vmatpush1.bf16.msra.mxu0 %v5355_v18  ;;  %v5426_v16 = vld [vmem:[%s7316_s8 + $0x14] ss:$28 sps:$4 sm:$0xff]  }
 0x3c4   :  { %3876 = vmatprep.subr.bf16.mxu1 %v5360_v19  ;;  %3958 = vmatprep.subr.bf16.mxu0 %v5363_v20  ;;  %v5427_v18 = vld [vmem:[%s7316_s8 + $0x1d8] ss:$28 sps:$4 sm:$0xff]   ;;  %v5424_v19 = vld [vmem:[%s7316_s8 + $0x10] ss:$28 sps:$4 sm:$0xff]  }
 0x3c7   :  { %3877 = vmatpush1.bf16.msra.mxu1 %v5358_v21  ;;  %3959 = vmatpush1.bf16.msra.mxu0 %v5361_v22  ;;  %v5428_v21 = vld [vmem:[%s7316_s8 + $0x18] ss:$28 sps:$4 sm:$0xff]   ;;  %v5431_v22 = vld [vmem:[%s7316_s8 + $0x4c] ss:$28 sps:$4 sm:$0xff]  }
 0x3c8   :  { %3878 = vmatprep.subr.bf16.mxu1 %v5366_v23  ;;  %3960 = vmatprep.subr.bf16.mxu0 %v5369_v24  ;;  %v5432_v23 = vld [vmem:[%s7316_s8 + $0x210] ss:$28 sps:$4 sm:$0xff]   ;;  %v5429_v24 = vld [vmem:[%s7316_s8 + $0x48] ss:$28 sps:$4 sm:$0xff]  }
 0x3c9   :  { %v6868_v30 = vpop.f32.mrb[8].mxu1 }
 0x3ca   :  { %v2367_v31 = vpop.f32.mrb[9].mxu1  ;;  %v2366_v10 = vadd.f32 %v6868_v30, %v2121_v6  ;;  %v5442_v30 = vld [vmem:[%s7316_s8 + $0x280] ss:$28 sps:$4 sm:$0xff]  }
 0x3cb   :  { %v2368_v32 = vadd.f32 %v2367_v31, %v2125_v25  ;;  %v2369_v33 = vpop.f32.mrb[10].mxu1  ;;  %3879 = vmatpush1.bf16.msra.mxu1 %v5364_v26  ;;  %3961 = vmatpush1.bf16.msra.mxu0 %v5367_v27  ;;  %v5433_v25 = vld [vmem:[%s7316_s8 + $0x50] ss:$28 sps:$4 sm:$0xff]   ;;  %v5436_v26 = vld [vmem:[%s7316_s8 + $0x84] ss:$28 sps:$4 sm:$0xff]  }
 0x3cc   :  { %v2370_v36 = vpop.f32.mrb[11].mxu1  ;;  %3880 = vmatprep.subr.bf16.mxu1 %v5372_v28  ;;  %3962 = vmatprep.subr.bf16.mxu0 %v5375_v29  ;;  %v2374_v15 = vmax.f32 %v2366_v10, 0.0  ;;  %v5437_v27 = vld [vmem:[%s7316_s8 + $0x248] ss:$28 sps:$4 sm:$0xff]   ;;  %v5434_v28 = vld [vmem:[%s7316_s8 + $0x80] ss:$28 sps:$4 sm:$0xff]  }
 0x3cd   :  { %v2375_v39 = vmax.f32 %v2368_v32, 0.0  ;;  %v5441_v29 = vld [vmem:[%s7316_s8 + $0xbc] ss:$28 sps:$4 sm:$0xff]   ;;  %v5446_v33 = vld [vmem:[%s7316_s8 + $0xf4] ss:$28 sps:$4 sm:$0xff]  }
 0x3ce   :  { %v6988_v20 = vpack.c.bf16 %v2374_v15, %v2374_v15  ;;  %v5439_v31 = vld [vmem:[%s7316_s8 + $0xb8] ss:$28 sps:$4 sm:$0xff]   ;;  %v5443_v32 = vld [vmem:[%s7316_s8 + $0xc0] ss:$28 sps:$4 sm:$0xff]   ;;  %v5484_v10 = vld [vmem:[%s7316_s8 + $0x2b0] ss:$28 sps:$4 sm:$0xff]  }
 0x3cf   :  { %v6882_v40 = vpack.c.bf16 %v2375_v39, %v2375_v39  ;;  %3881 = vmatpush1.bf16.msra.mxu1 %v5370_v34  ;;  %3963 = vmatpush1.bf16.msra.mxu0 %v5373_v35  ;;  %v5447_v34 = vld [vmem:[%s7316_s8 + $0x2b8] ss:$28 sps:$4 sm:$0xff]   ;;  %v5444_v35 = vld [vmem:[%s7316_s8 + $0xf0] ss:$28 sps:$4 sm:$0xff]   ;;  %v5449_v39 = vld [vmem:[%s7316_s8 + $0x128] ss:$28 sps:$4 sm:$0xff]  }
 0x3d0   :  { %3882 = vmatprep.subr.bf16.mxu1 %v5378_v37  ;;  %3964 = vmatprep.subr.bf16.mxu0 %v5381_v38  ;;  %v5448_v36 = vld [vmem:[%s7316_s8 + $0xf8] ss:$28 sps:$4 sm:$0xff]   ;;  %v5451_v37 = vld [vmem:[%s7316_s8 + $0x12c] ss:$28 sps:$4 sm:$0xff]   ;;  %v5482_v6 = vld [vmem:[%s7316_s8 + $0x600] ss:$28 sps:$4 sm:$0xff]  }
 0x3d1   :  { %3898 = vmatprep.mubr.bf16.mxu1 %v6882_v40  ;;  %3980 = vmatprep.mubr.bf16.mxu0 %v6882_v40  ;;  %v5452_v38 = vld [vmem:[%s7316_s8 + $0x2f0] ss:$28 sps:$4 sm:$0xff]  }
 0x3d2   :  { %v5493_v15 = vld [vmem:[%s7316_s8 + $0x4b0] ss:$28 sps:$4 sm:$0xff]  }
 0x3d3   :  { %3883 = vmatpush1.bf16.msra.mxu1 %v5376_v41  ;;  %3965 = vmatpush1.bf16.msra.mxu0 %v5379_v42  ;;  %v5453_v41 = vld [vmem:[%s7316_s8 + $0x130] ss:$28 sps:$4 sm:$0xff]   ;;  %v5456_v42 = vld [vmem:[%s7316_s8 + $0x164] ss:$28 sps:$4 sm:$0xff]  }
 0x3d4   :  { %3884 = vmatprep.subr.bf16.mxu1 %v5384_v43  ;;  %3966 = vmatprep.subr.bf16.mxu0 %v5387_v45  ;;  %v5457_v43 = vld [vmem:[%s7316_s8 + $0x328] ss:$28 sps:$4 sm:$0xff]   ;;  %v5454_v45 = vld [vmem:[%s7316_s8 + $0x160] ss:$28 sps:$4 sm:$0xff]  }
 0x3d7   :  { %3885 = vmatpush1.bf16.msra.mxu1 %v5382_v46  ;;  %3967 = vmatpush1.bf16.msra.mxu0 %v5385_v47  ;;  %v5458_v46 = vld [vmem:[%s7316_s8 + $0x168] ss:$28 sps:$4 sm:$0xff]   ;;  %v5461_v47 = vld [vmem:[%s7316_s8 + $0x19c] ss:$28 sps:$4 sm:$0xff]  }
 0x3d8   :  { %3886 = vmatprep.subr.bf16.mxu1 %v5390_v49  ;;  %3968 = vmatprep.subr.bf16.mxu0 %v5393_v50  ;;  %v5462_v49 = vld [vmem:[%s7316_s8 + $0x360] ss:$28 sps:$4 sm:$0xff]   ;;  %v5459_v50 = vld [vmem:[%s7316_s8 + $0x198] ss:$28 sps:$4 sm:$0xff]  }
 0x3db   :  { %3887 = vmatpush1.bf16.msra.mxu1 %v5388_v51  ;;  %3969 = vmatpush1.bf16.msra.mxu0 %v5391_v52  ;;  %v5463_v51 = vld [vmem:[%s7316_s8 + $0x1a0] ss:$28 sps:$4 sm:$0xff]   ;;  %v5466_v52 = vld [vmem:[%s7316_s8 + $0x1d4] ss:$28 sps:$4 sm:$0xff]  }
 0x3dc   :  { %3888 = vmatprep.subr.bf16.mxu1 %v5396_v53  ;;  %3970 = vmatprep.subr.bf16.mxu0 %v5399_v54  ;;  %v5467_v53 = vld [vmem:[%s7316_s8 + $0x558] ss:$28 sps:$4 sm:$0xff]   ;;  %v5464_v54 = vld [vmem:[%s7316_s8 + $0x1d0] ss:$28 sps:$4 sm:$0xff]  }
 0x3df   :  { %3889 = vmatpush1.bf16.msra.mxu1 %v5394_v55  ;;  %3971 = vmatpush1.bf16.msra.mxu0 %v5397_v56  ;;  %v5468_v55 = vld [vmem:[%s7316_s8 + $0x398] ss:$28 sps:$4 sm:$0xff]   ;;  %v5471_v56 = vld [vmem:[%s7316_s8 + $0x20c] ss:$28 sps:$4 sm:$0xff]  }
 0x3e0   :  { %3890 = vmatprep.subr.bf16.mxu1 %v5402_v59  ;;  %3972 = vmatprep.subr.bf16.mxu0 %v5405_v62  ;;  %v5472_v59 = vld [vmem:[%s7316_s8 + $0x590] ss:$28 sps:$4 sm:$0xff]   ;;  %v5469_v62 = vld [vmem:[%s7316_s8 + $0x208] ss:$28 sps:$4 sm:$0xff]  }
 0x3e3   :  { %3891 = vmatpush1.bf16.msra.mxu1 %v5400_v0  ;;  %3973 = vmatpush1.bf16.msra.mxu0 %v5403_v17  ;;  %v5473_v0 = vld [vmem:[%s7316_s8 + $0x3d0] ss:$28 sps:$4 sm:$0xff]   ;;  %v5476_v17 = vld [vmem:[%s7316_s8 + $0x244] ss:$28 sps:$4 sm:$0xff]  }
 0x3e4   :  { %3892 = vmatprep.subr.bf16.mxu1 %v5408_v2  ;;  %3974 = vmatprep.subr.bf16.mxu0 %v5411_v3  ;;  %v5477_v2 = vld [vmem:[%s7316_s8 + $0x5c8] ss:$28 sps:$4 sm:$0xff]   ;;  %v5474_v3 = vld [vmem:[%s7316_s8 + $0x240] ss:$28 sps:$4 sm:$0xff]  }
 0x3e7   :  { %3893 = vmatpush1.bf16.msra.mxu1 %v5406_v4  ;;  %3975 = vmatpush1.bf16.msra.mxu0 %v5409_v5  ;;  %v5478_v4 = vld [vmem:[%s7316_s8 + $0x408] ss:$28 sps:$4 sm:$0xff]   ;;  %v5481_v5 = vld [vmem:[%s7316_s8 + $0x27c] ss:$28 sps:$4 sm:$0xff]  }
 0x3e8   :  { %3894 = vmatprep.subr.bf16.mxu1 %v5414_v7  ;;  %3976 = vmatprep.subr.bf16.mxu0 %v5417_v8  ;;  %v5479_v7 = vld [vmem:[%s7316_s8 + $0x278] ss:$28 sps:$4 sm:$0xff]   ;;  %v5483_v8 = vld [vmem:[%s7316_s8 + $0x440] ss:$28 sps:$4 sm:$0xff]  }
 0x3eb   :  { %3895 = vmatpush1.bf16.msra.mxu1 %v5412_v9  ;;  %3977 = vmatpush1.bf16.msra.mxu0 %v5415_v48  ;;  %v5486_v9 = vld [vmem:[%s7316_s8 + $0x2b4] ss:$28 sps:$4 sm:$0xff]  }
 0x3ec   :  { %3896 = vmatprep.subr.bf16.mxu1 %v5420_v11  ;;  %3978 = vmatprep.subr.bf16.mxu0 %v5423_v12  ;;  %v5487_v48 = vld [vmem:[%s7316_s8 + $0x638] ss:$28 sps:$4 sm:$0xff]   ;;  %v5491_v12 = vld [vmem:[%s7316_s8 + $0x2ec] ss:$28 sps:$4 sm:$0xff]  }
 0x3ed   :  { %v5488_v11 = vld [vmem:[%s7316_s8 + $0x478] ss:$28 sps:$4 sm:$0xff]  }
 0x3ef   :  { %3897 = vmatpush1.bf16.msra.mxu1 %v5418_v13  ;;  %3979 = vmatpush1.bf16.msra.mxu0 %v5421_v14  ;;  %v5492_v13 = vld [vmem:[%s7316_s8 + $0x670] ss:$28 sps:$4 sm:$0xff]   ;;  %v5489_v14 = vld [vmem:[%s7316_s8 + $0x2e8] ss:$28 sps:$4 sm:$0xff]  }
 0x3f0   :  { %3989 = vmatprep.subr.bf16.mxu1 %v5426_v16  ;;  %4697 = vmatprep.subr.bf16.mxu0 %v5427_v18  ;;  %v5496_v16 = vld [vmem:[%s7316_s8 + $0x324] ss:$28 sps:$4 sm:$0xff]  }
 0x3f1   :  { %v5497_v18 = vld [vmem:[%s7316_s8 + $0x6a8] ss:$28 sps:$4 sm:$0xff]  }
 0x3f2   :  { %3899 = vmatmul.mubr.bf16.vlgmr.msra.gmra.mrb[12].mxu1 %v6988_v20  ;;  %3981 = vmatmul.mubr.bf16.vlgmr.msra.gmra.mrb[8].mxu0 %v6988_v20 }
 0x3f3   :  { %3990 = vmatpush1.bf16.msra.mxu1 %v5424_v19  ;;  %4021 = vmatprep.mubr.bf16.mxu1 %v6774_v63  ;;  %v5494_v19 = vld [vmem:[%s7316_s8 + $0x320] ss:$28 sps:$4 sm:$0xff]  }
 0x3f4   :  { %4698 = vmatpush3.bf16.msra.mxu0 %v5428_v21  ;;  %4103 = vmatprep.mubr.bf16.mxu0 %v6774_v63  ;;  %v5438_v63 = vld [vmem:[%s7316_s8 + $0x88] ss:$28 sps:$4 sm:$0xff]  }
 0x3f5   :  { %3991 = vmatprep.subr.bf16.mxu1 %v5431_v22  ;;  %4699 = vmatprep.subr.bf16.mxu0 %v5432_v23  ;;  %v5498_v21 = vld [vmem:[%s7316_s8 + $0x4e8] ss:$28 sps:$4 sm:$0xff]   ;;  %v5501_v22 = vld [vmem:[%s7316_s8 + $0x35c] ss:$28 sps:$4 sm:$0xff]  }
 0x3f6   :  { %v5502_v23 = vld [vmem:[%s7316_s8 + $0x6e0] ss:$28 sps:$4 sm:$0xff]  }
 0x3f7   :  { %3992 = vmatpush1.bf16.msra.mxu1 %v5429_v24  ;;  %v5499_v24 = vld [vmem:[%s7316_s8 + $0x358] ss:$28 sps:$4 sm:$0xff]  }
 0x3f8   :  { %4700 = vmatpush3.bf16.msra.mxu0 %v5433_v25  ;;  %3993 = vmatprep.subr.bf16.mxu1 %v5436_v26  ;;  %v5503_v25 = vld [vmem:[%s7316_s8 + $0x520] ss:$28 sps:$4 sm:$0xff]   ;;  %v5506_v26 = vld [vmem:[%s7316_s8 + $0x394] ss:$28 sps:$4 sm:$0xff]  }
 0x3f9   :  { %4701 = vmatprep.subr.bf16.mxu0 %v5437_v27  ;;  %v5504_v27 = vld [vmem:[%s7316_s8 + $0x390] ss:$28 sps:$4 sm:$0xff]  }
 0x3fb   :  { %3994 = vmatpush1.bf16.msra.mxu1 %v5434_v28  ;;  %v5509_v28 = vld [vmem:[%s7316_s8 + $0x3cc] ss:$28 sps:$4 sm:$0xff]  }
 0x3fc   :  { %4702 = vmatpush3.bf16.msra.mxu0 %v5438_v63  ;;  %3995 = vmatprep.subr.bf16.mxu1 %v5441_v29  ;;  %v5507_v63 = vld [vmem:[%s7316_s8 + $0x3c8] ss:$28 sps:$4 sm:$0xff]  }
 0x3fd   :  { %4703 = vmatprep.subr.bf16.mxu0 %v5442_v30  ;;  %v5512_v29 = vld [vmem:[%s7316_s8 + $0x404] ss:$28 sps:$4 sm:$0xff]  }
 0x3fe   :  { %v5510_v30 = vld [vmem:[%s7316_s8 + $0x400] ss:$28 sps:$4 sm:$0xff]  }
 0x3ff   :  { %3996 = vmatpush1.bf16.msra.mxu1 %v5439_v31  ;;  %v5518_v31 = vld [vmem:[%s7316_s8 + $0x474] ss:$28 sps:$4 sm:$0xff]  }
 0x400   :  { %4704 = vmatpush3.bf16.msra.mxu0 %v5443_v32  ;;  %3997 = vmatprep.subr.bf16.mxu1 %v5446_v33  ;;  %v5516_v32 = vld [vmem:[%s7316_s8 + $0x470] ss:$28 sps:$4 sm:$0xff]  }
 0x401   :  { %4705 = vmatprep.subr.bf16.mxu0 %v5447_v34  ;;  %v5521_v33 = vld [vmem:[%s7316_s8 + $0x4ac] ss:$28 sps:$4 sm:$0xff]  }
 0x402   :  { %v5519_v34 = vld [vmem:[%s7316_s8 + $0x4a8] ss:$28 sps:$4 sm:$0xff]  }
 0x403   :  { %3998 = vmatpush1.bf16.msra.mxu1 %v5444_v35  ;;  %v5524_v35 = vld [vmem:[%s7316_s8 + $0x4e4] ss:$28 sps:$4 sm:$0xff]  }
 0x404   :  { %4706 = vmatpush3.bf16.msra.mxu0 %v5448_v36  ;;  %3999 = vmatprep.subr.bf16.mxu1 %v5451_v37  ;;  %v5522_v36 = vld [vmem:[%s7316_s8 + $0x4e0] ss:$28 sps:$4 sm:$0xff]  }
 0x405   :  { %4707 = vmatprep.subr.bf16.mxu0 %v5452_v38  ;;  %v5527_v37 = vld [vmem:[%s7316_s8 + $0x51c] ss:$28 sps:$4 sm:$0xff]  }
 0x406   :  { %v5525_v38 = vld [vmem:[%s7316_s8 + $0x518] ss:$28 sps:$4 sm:$0xff]  }
 0x407   :  { %4000 = vmatpush1.bf16.msra.mxu1 %v5449_v39  ;;  %v5530_v39 = vld [vmem:[%s7316_s8 + $0x554] ss:$28 sps:$4 sm:$0xff]  }
 0x408   :  { %4708 = vmatpush3.bf16.msra.mxu0 %v5453_v41  ;;  %4001 = vmatprep.subr.bf16.mxu1 %v5456_v42  ;;  %v5528_v41 = vld [vmem:[%s7316_s8 + $0x550] ss:$28 sps:$4 sm:$0xff]  }
 0x409   :  { %4709 = vmatprep.subr.bf16.mxu0 %v5457_v43  ;;  %v5533_v42 = vld [vmem:[%s7316_s8 + $0x58c] ss:$28 sps:$4 sm:$0xff]  }
 0x40a   :  { %v5531_v43 = vld [vmem:[%s7316_s8 + $0x588] ss:$28 sps:$4 sm:$0xff]  }
 0x40b   :  { %4002 = vmatpush1.bf16.msra.mxu1 %v5454_v45  ;;  %v5536_v45 = vld [vmem:[%s7316_s8 + $0x5c4] ss:$28 sps:$4 sm:$0xff]  }
 0x40c   :  { %4710 = vmatpush3.bf16.msra.mxu0 %v5458_v46  ;;  %4003 = vmatprep.subr.bf16.mxu1 %v5461_v47  ;;  %v5534_v46 = vld [vmem:[%s7316_s8 + $0x5c0] ss:$28 sps:$4 sm:$0xff]  }
 0x40d   :  { %4711 = vmatprep.subr.bf16.mxu0 %v5462_v49  ;;  %v5539_v47 = vld [vmem:[%s7316_s8 + $0x5fc] ss:$28 sps:$4 sm:$0xff]  }
 0x40e   :  { %v5537_v49 = vld [vmem:[%s7316_s8 + $0x5f8] ss:$28 sps:$4 sm:$0xff]  }
 0x40f   :  { %4004 = vmatpush1.bf16.msra.mxu1 %v5459_v50  ;;  %v5542_v50 = vld [vmem:[%s7316_s8 + $0x634] ss:$28 sps:$4 sm:$0xff]  }
 0x410   :  { %4712 = vmatpush3.bf16.msra.mxu0 %v5463_v51  ;;  %4005 = vmatprep.subr.bf16.mxu1 %v5466_v52  ;;  %v5540_v51 = vld [vmem:[%s7316_s8 + $0x630] ss:$28 sps:$4 sm:$0xff]  }
 0x411   :  { %4719 = vmatprep.subr.bf16.mxu0 %v5467_v53  ;;  %v5545_v52 = vld [vmem:[%s7316_s8 + $0x66c] ss:$28 sps:$4 sm:$0xff]  }
 0x412   :  { %v5543_v53 = vld [vmem:[%s7316_s8 + $0x668] ss:$28 sps:$4 sm:$0xff]  }
 0x413   :  { %4104 = vmatmul.mubr.bf16.vlgmr.msra.gmra.mrb[12].mxu0 %v6782_v1  ;;  %4006 = vmatpush1.bf16.msra.mxu1 %v5464_v54  ;;  %v5548_v54 = vld [vmem:[%s7316_s8 + $0x6a4] ss:$28 sps:$4 sm:$0xff]  }
 0x414   :  { %4720 = vmatpush3.bf16.msra.mxu0 %v5468_v55  ;;  %4143 = vmatprep.mubr.bf16.mxu0 %v6882_v40  ;;  %v5546_v55 = vld [vmem:[%s7316_s8 + $0x6a0] ss:$28 sps:$4 sm:$0xff]  }
 0x415   :  { %4007 = vmatprep.subr.bf16.mxu1 %v5471_v56  ;;  %4721 = vmatprep.subr.bf16.mxu0 %v5472_v59  ;;  %v5551_v56 = vld [vmem:[%s7316_s8 + $0x6dc] ss:$28 sps:$4 sm:$0xff]  }
 0x416   :  { %v5549_v59 = vld [vmem:[%s7316_s8 + $0x6d8] ss:$28 sps:$4 sm:$0xff]  }
 0x417   :  { %4008 = vmatpush1.bf16.msra.mxu1 %v5469_v62  ;;  %v2636_v62 = vld [vmem:[%s7322_s9] sm:$0x7f] }
 0x418   :  { %4722 = vmatpush3.bf16.msra.mxu0 %v5473_v0  ;;  %4009 = vmatprep.subr.bf16.mxu1 %v5476_v17  ;;  %v2641_v0 = vrot.slane %v2636_v62, %v6348_v58  ;;  %v2649_v17 = vrot.slane %v2636_v62, %v6445_v44 }
 0x419   :  { %4723 = vmatprep.subr.bf16.mxu0 %v5477_v2  ;;  %v2645_v2 = vrot.slane %v2636_v62, %v6356_v60 }
 0x41b   :  { %4010 = vmatpush1.bf16.msra.mxu1 %v5474_v3  ;;  %v2653_v3 = vrot.slane %v2636_v62, %v6359_v61 }
 0x41c   :  { %4724 = vmatpush3.bf16.msra.mxu0 %v5478_v4  ;;  %4011 = vmatprep.subr.bf16.mxu1 %v5481_v5 }
 0x41d   :  { %4725 = vmatprep.subr.bf16.mxu0 %v5482_v6 }
 0x41f   :  { %4012 = vmatpush1.bf16.msra.mxu1 %v5479_v7 }
 0x420   :  { %4726 = vmatpush3.bf16.msra.mxu0 %v5483_v8  ;;  %4013 = vmatprep.subr.bf16.mxu1 %v5486_v9 }
 0x421   :  { %4727 = vmatprep.subr.bf16.mxu0 %v5487_v48 }
 0x423   :  { %4014 = vmatpush1.bf16.msra.mxu1 %v5484_v10 }
 0x424   :  { %4728 = vmatpush3.bf16.msra.mxu0 %v5488_v11  ;;  %4015 = vmatprep.subr.bf16.mxu1 %v5491_v12 }
 0x425   :  { %4729 = vmatprep.subr.bf16.mxu0 %v5492_v13 }
 0x427   :  { %4016 = vmatpush1.bf16.msra.mxu1 %v5489_v14 }
 0x428   :  { %4730 = vmatpush3.bf16.msra.mxu0 %v5493_v15  ;;  %4017 = vmatprep.subr.bf16.mxu1 %v5496_v16 }
 0x429   :  { %4731 = vmatprep.subr.bf16.mxu0 %v5497_v18 }
 0x42b   :  { %4018 = vmatpush1.bf16.msra.mxu1 %v5494_v19 }
 0x42c   :  { %4732 = vmatpush3.bf16.msra.mxu0 %v5498_v21  ;;  %4019 = vmatprep.subr.bf16.mxu1 %v5501_v22  ;;  %v2664_v21 = vsub.s32 6, %v6345_v57 }
 0x42d   :  { %4733 = vmatprep.subr.bf16.mxu0 %v5502_v23 }
 0x42e   :  { %v2665_v22 = vrot.slane %v2636_v62, %v2664_v21 }
 0x42f   :  { %4020 = vmatpush1.bf16.msra.mxu1 %v5499_v24 }
 0x430   :  { %4734 = vmatpush3.bf16.msra.mxu0 %v5503_v25  ;;  %4030 = vmatprep.subr.bf16.mxu1 %v5506_v26 }
 0x432   :  { %4022 = vmatmul.mubr.bf16.vlgmr.msra.gmra.mrb[16].mxu1 %v6782_v1  ;;  %v5515_v1 = vld [vmem:[%s7316_s8 + $0x43c] ss:$28 sps:$4 sm:$0xff]  }
 0x433   :  { %4144 = vmatmul.mubr.bf16.vlgmr.msra.gmra.mrb[16].mxu0 %v6988_v20  ;;  %4031 = vmatpush1.bf16.msra.mxu1 %v5504_v27 }
 0x434   :  { %4062 = vmatprep.mubr.bf16.mxu1 %v6882_v40  ;;  %4032 = vmatprep.subr.bf16.mxu1 %v5509_v28  ;;  %v5513_v40 = vld [vmem:[%s7316_s8 + $0x438] ss:$28 sps:$4 sm:$0xff]  }
 0x437   :  { %4033 = vmatpush1.bf16.msra.mxu1 %v5507_v63 }
 0x438   :  { %4034 = vmatprep.subr.bf16.mxu1 %v5512_v29 }
 0x43b   :  { %4035 = vmatpush1.bf16.msra.mxu1 %v5510_v30  ;;  %v2656_v30 = vsub.s32 4, %v6345_v57 }
 0x43c   :  { %4036 = vmatprep.subr.bf16.mxu1 %v5515_v1  ;;  %v2660_v1 = vsub.s32 5, %v6345_v57 }
 0x43f   :  { %4037 = vmatpush1.bf16.msra.mxu1 %v5513_v40  ;;  %v2657_v40 = vrot.slane %v2636_v62, %v2656_v30 }
 0x440   :  { %4038 = vmatprep.subr.bf16.mxu1 %v5518_v31  ;;  %v2661_v31 = vrot.slane %v2636_v62, %v2660_v1 }
 0x443   :  { %4039 = vmatpush1.bf16.msra.mxu1 %v5516_v32 }
 0x444   :  { %4040 = vmatprep.subr.bf16.mxu1 %v5521_v33 }
 0x447   :  { %4041 = vmatpush1.bf16.msra.mxu1 %v5519_v34 }
 0x448   :  { %4042 = vmatprep.subr.bf16.mxu1 %v5524_v35 }
 0x44b   :  { %4043 = vmatpush1.bf16.msra.mxu1 %v5522_v36 }
 0x44c   :  { %4044 = vmatprep.subr.bf16.mxu1 %v5527_v37 }
 0x44f   :  { %4045 = vmatpush1.bf16.msra.mxu1 %v5525_v38 }
 0x450   :  { %4046 = vmatprep.subr.bf16.mxu1 %v5530_v39 }
 0x453   :  { %4047 = vmatpush1.bf16.msra.mxu1 %v5528_v41 }
 0x454   :  { %4048 = vmatprep.subr.bf16.mxu1 %v5533_v42 }
 0x457   :  { %4049 = vmatpush1.bf16.msra.mxu1 %v5531_v43 }
 0x458   :  { %4050 = vmatprep.subr.bf16.mxu1 %v5536_v45 }
 0x45b   :  { %4051 = vmatpush1.bf16.msra.mxu1 %v5534_v46 }
 0x45c   :  { %4052 = vmatprep.subr.bf16.mxu1 %v5539_v47 }
 0x45f   :  { %4053 = vmatpush1.bf16.msra.mxu1 %v5537_v49 }
 0x460   :  { %4054 = vmatprep.subr.bf16.mxu1 %v5542_v50 }
 0x463   :  { %4055 = vmatpush1.bf16.msra.mxu1 %v5540_v51 }
 0x464   :  { %4056 = vmatprep.subr.bf16.mxu1 %v5545_v52 }
 0x467   :  { %4057 = vmatpush1.bf16.msra.mxu1 %v5543_v53 }
 0x468   :  { %4058 = vmatprep.subr.bf16.mxu1 %v5548_v54 }
 0x46b   :  { %4059 = vmatpush1.bf16.msra.mxu1 %v5546_v55 }
 0x46c   :  { %4060 = vmatprep.subr.bf16.mxu1 %v5551_v56 }
 0x46f   :  { %4061 = vmatpush1.bf16.msra.mxu1 %v5549_v59 }
 0x472   :  { %4063 = vmatmul.mubr.bf16.vlgmr.msra.gmra.mrb[16].mxu1 %v6988_v20 }
 0x4c5   :  { %v3900_v4 = vpop.f32.mrb[12].mxu1  ;;  %v3982_v5 = vpop.f32.mrb[8].mxu0 }
 0x4c6   :  { %v4747_v6 = vadd.f32 %v3900_v4, %v2641_v0  ;;  %v4749_v7 = vadd.f32 %v3982_v5, %v2649_v17  ;;  %v3902_v8 = vpop.f32.mrb[13].mxu1  ;;  %v3984_v9 = vpop.f32.mrb[9].mxu0 }
 0x4c7   :  { %v4748_v48 = vadd.f32 %v3902_v8, %v2645_v2  ;;  %v4750_v20 = vadd.f32 %v3984_v9, %v2653_v3  ;;  %v3904_v10 = vpop.f32.mrb[14].mxu1  ;;  %v3986_v11 = vpop.f32.mrb[10].mxu0 }
 0x4c8   :  { %v4151_v12 = vmax.f32 %v4747_v6, 0.0  ;;  %v4153_v13 = vmax.f32 %v4749_v7, 0.0  ;;  %v3905_v14 = vpop.f32.mrb[15].mxu1  ;;  %v3987_v58 = vpop.f32.mrb[11].mxu0 }
 0x4c9   :  { %v4152_v15 = vmax.f32 %v4748_v48, 0.0  ;;  %v4154_v44 = vmax.f32 %v4750_v20, 0.0 }
 0x4ca   :  { %4158 = vst [vmem:[%s7323_s10] sm:$0xff] %v4151_v12  ;;  %4160 = vst [vmem:[%s7323_s10 + $0x10] sm:$0xff] %v4153_v13 }
 0x4cb   :  { %4159 = vst [vmem:[%s7323_s10 + $0x8] sm:$0xff] %v4152_v15  ;;  %4161 = vst [vmem:[%s7323_s10 + $0x18] sm:$0xff] %v4154_v44 }
 0x4e6   :  { %v4713_v60 = vpop.f32.mrb[12].mxu0 }
 0x4e7   :  { %v4714_v61 = vpop.f32.mrb[13].mxu0 }
 0x4e8   :  { %v4715_v16 = vadd.f32 %v4714_v61, %v4713_v60  ;;  %v4716_v18 = vpop.f32.mrb[14].mxu0 }
 0x4e9   :  { %v4717_v19 = vpop.f32.mrb[15].mxu0 }
 0x4ea   :  { %v4106_v25 = vadd.f32 %v4715_v16, %v2665_v22 }
 0x506   :  { %v4735_v23 = vpop.f32.mrb[16].mxu0 }
 0x507   :  { %v4736_v24 = vpop.f32.mrb[17].mxu0 }
 0x508   :  { %v4737_v26 = vadd.f32 %v4736_v24, %v4735_v23  ;;  %v4738_v27 = vpop.f32.mrb[18].mxu0 }
 0x509   :  { %v4739_v28 = vpop.f32.mrb[19].mxu0 }
 0x50a   :  { %v4146_v63 = vadd.f32 %v4737_v26, %v4106_v25 }
 0x50c   :  { %v4157_v29 = vmax.f32 %v4146_v63, 0.0 }
 0x50e   :  { %4164 = vst.msk [vmem:[%s7323_s10 + $0x30] sm:$0xff] %vm1251_vm0, %v4157_v29 }
 0x545   :  { %v4064_v32 = vpop.f32.mrb[16].mxu1 }
 0x546   :  { %v4751_v33 = vadd.f32 %v4064_v32, %v2657_v40  ;;  %v4066_v34 = vpop.f32.mrb[17].mxu1 }
 0x547   :  { %v4752_v35 = vadd.f32 %v4066_v34, %v2661_v31  ;;  %v4068_v36 = vpop.f32.mrb[18].mxu1 }
 0x548   :  { %v4155_v37 = vmax.f32 %v4751_v33, 0.0  ;;  %v4069_v38 = vpop.f32.mrb[19].mxu1 }
 0x549   :  { %v4156_v39 = vmax.f32 %v4752_v35, 0.0 }
 0x54a   :  { %4162 = vst [vmem:[%s7323_s10 + $0x20] sm:$0xff] %v4155_v37 }
 0x54b   :  { %4163 = vst [vmem:[%s7323_s10 + $0x28] sm:$0xff] %v4156_v39 }

</bundles_post_ra>
